<compile_context>
chip_gen: v7x
topology: tpu7x:2x2x1
jax: 0.10.0
libtpu: 0.0.40
codegen_flags: <defaults>
</compile_context>

<pallas_src>
import functools

import jax
import jax.numpy as jnp
from jax.experimental import pallas as pl
from jax.experimental.pallas import tpu as pltpu


def _round_up(x, m):
    return (x + m - 1) // m * m


# ----------------------------------------------------------------------------
# Kernel
# ----------------------------------------------------------------------------
def _conv_block_kernel(x_ref, w1_ref, b1_ref, w2_ref, b2_ref,
                       wse1_ref, wse2_ref, o_ref, pad2_ref, *, H, W):
    """Fused conv1+BN1+ReLU -> conv2+BN2+ReLU -> Squeeze-Excite, per batch.

    Layout: channels on sublanes, flattened padded spatial (row stride PW=W+2)
    on lanes.  x_ref is the pre-padded, pre-flattened input (Cin, FLAT_IN) in
    bf16; pad2_ref is the stage-2 padded-activation scratch (Cout, FLAT) bf16.
    Flat index f = r*PW + c  <->  padded row r, padded column c.
    """
    PW = W + 2
    HPW = H * PW
    FLAT = pad2_ref.shape[-1]
    Cout = w1_ref.shape[1]

    # Lane-validity mask over the flattened output: column j (= h*PW + w) is a
    # real pixel iff w < W; the two trailing columns per row are junk.
    j = jax.lax.broadcasted_iota(jnp.int32, (1, HPW), 1)
    valid = (j % PW) < W                                        # (1, HPW) bool

    def conv3x3(src_ref, w_taps_ref, b_ref):
        """3x3 'same' conv as 9 accumulated MXU matmuls + folded-BN bias + ReLU.

        src_ref    : (C, FLAT) bf16 padded/flattened activations
        w_taps_ref : (9, Cout, C) bf16 per-tap weights (BN scale folded in)
        b_ref      : (Cout, 1) f32 folded bias
        returns    : (Cout, HPW) f32 (junk columns still contain ReLU(bias))
        """
        acc = jnp.zeros((Cout, HPW), jnp.float32)
        for dh in range(3):
            for dw in range(3):
                t = dh * 3 + dw
                tap = src_ref[:, pl.ds(dh * PW + dw, HPW)]       # (C, HPW) bf16
                acc += jnp.dot(w_taps_ref[t], tap,
                               preferred_element_type=jnp.float32)
        return jnp.maximum(acc + b_ref[...], 0.0)

    # ---- stage 1: conv1 (+ folded BN1) + ReLU, taps read directly from the
    #      wrapper-padded input block (no stage-1 scratch, no copies). ----
    feat1 = conv3x3(x_ref, w1_ref, b1_ref)                       # (Cout, HPW)
    feat1 = jnp.where(valid, feat1, 0.0)                         # zero junk cols

    # ---- fill the stage-2 padded scratch.  Only the never-overwritten halo
    #      stripes are zeroed (tiny stores); one contiguous lane-dense store of
    #      the masked stage-1 activations fills the interior AND the horizontal
    #      halos (the masked zeros land exactly on the left/right halo slots).
    pad2_ref[:, 0:PW + 1] = jnp.zeros((Cout, PW + 1), pad2_ref.dtype)
    pad2_ref[:, (H + 1) * PW + 1:] = jnp.zeros(
        (Cout, FLAT - (H + 1) * PW - 1), pad2_ref.dtype)
    pad2_ref[:, pl.ds(PW + 1, HPW)] = feat1.astype(pad2_ref.dtype)

    # ---- stage 2: conv2 (+ folded BN2) + ReLU (stage-1 output stays on-chip)
    feat2 = conv3x3(pad2_ref, w2_ref, b2_ref)                    # (Cout, HPW)
    feat2 = jnp.where(valid, feat2, 0.0)

    # ---- squeeze-excite: global average pool (lane-axis reduction over valid
    #      columns only) -> FC -> ReLU -> FC -> sigmoid -> per-channel scale.
    pooled = jnp.sum(feat2, axis=-1, keepdims=True) * (1.0 / (H * W))  # (Cout,1)
    h1 = jnp.maximum(jnp.dot(wse1_ref[...], pooled,
                             preferred_element_type=jnp.float32), 0.0)  # (Cr,1)
    gate = jax.nn.sigmoid(jnp.dot(wse2_ref[...], h1,
                                  preferred_element_type=jnp.float32))  # (Cout,1)

    o_ref[...] = (feat2 * gate).astype(o_ref.dtype)              # (Cout, HPW)


# ----------------------------------------------------------------------------
# Wrapper (BN folding, tap-weight reshape, layout plumbing, BlockSpecs)
# ----------------------------------------------------------------------------
def _fold_bn(conv_bias, gamma, beta, mean, var, eps=1e-5):
    scale = gamma / jnp.sqrt(var + eps)
    bias = (conv_bias - mean) * scale + beta
    return scale, bias


def _conv_w_to_taps(w_oihw, scale):
    """OIHW conv weight -> (9, Cout, Cin) bf16 taps with BN scale folded in."""
    cout, cin = w_oihw.shape[0], w_oihw.shape[1]
    w = w_oihw * scale[:, None, None, None]
    w = jnp.transpose(w, (2, 3, 0, 1)).reshape(9, cout, cin)     # t = dh*3 + dw
    return w.astype(jnp.bfloat16)


def conv_block_forward(x_nchw, params):
    """Forward pass of Conv_Block. Input/output are NCHW (PyTorch convention)."""
    N, Cin, H, W = x_nchw.shape
    Cout = params["conv1_w"].shape[0]
    PW = W + 2
    HPW = H * PW
    # flat length >= (H+2)*PW + 2 (last tap slice overruns by 2), lane-rounded
    FLAT = _round_up((H + 2) * PW + 2, 128)

    s1, b1 = _fold_bn(params["conv1_b"], params["bn1_gamma"], params["bn1_beta"],
                      params["bn1_mean"], params["bn1_var"])
    s2, b2 = _fold_bn(params["conv2_b"], params["bn2_gamma"], params["bn2_beta"],
                      params["bn2_mean"], params["bn2_var"])
    w1 = _conv_w_to_taps(params["conv1_w"], s1)                  # (9, Cout, Cin)
    w2 = _conv_w_to_taps(params["conv2_w"], s2)                  # (9, Cout, Cout)
    b1 = b1.reshape(Cout, 1).astype(jnp.float32)
    b2 = b2.reshape(Cout, 1).astype(jnp.float32)
    wse1 = params["se_fc1_w"].astype(jnp.float32)                # (Cout//r, Cout)
    wse2 = params["se_fc2_w"].astype(jnp.float32)                # (Cout, Cout//r)
    Cred = wse1.shape[0]

    # One-time 1-pixel zero pad + flatten of the input in XLA (NCHW is already
    # channel-major, so no layout transpose is needed), cast to bf16 for the MXU.
    xp = jnp.pad(x_nchw, ((0, 0), (0, 0), (1, 1), (1, 1)))       # (N,Cin,H+2,W+2)
    xp = xp.reshape(N, Cin, (H + 2) * PW)
    xp = jnp.pad(xp, ((0, 0), (0, 0), (0, FLAT - (H + 2) * PW)))
    xp = xp.astype(jnp.bfloat16)                                 # (N, Cin, FLAT)

    kernel = functools.partial(_conv_block_kernel, H=H, W=W)

    out = pl.pallas_call(
        kernel,
        out_shape=jax.ShapeDtypeStruct((N, Cout, HPW), jnp.float32),
        grid_spec=pltpu.PrefetchScalarGridSpec(
            num_scalar_prefetch=0,
            grid=(N,),
            in_specs=[
                pl.BlockSpec((pl.Squeezed(), Cin, FLAT), lambda b: (b, 0, 0)),
                pl.BlockSpec((9, Cout, Cin), lambda b: (0, 0, 0)),
                pl.BlockSpec((Cout, 1), lambda b: (0, 0)),
                pl.BlockSpec((9, Cout, Cout), lambda b: (0, 0, 0)),
                pl.BlockSpec((Cout, 1), lambda b: (0, 0)),
                pl.BlockSpec((Cred, Cout), lambda b: (0, 0)),
                pl.BlockSpec((Cout, Cred), lambda b: (0, 0)),
            ],
            out_specs=pl.BlockSpec((pl.Squeezed(), Cout, HPW),
                                   lambda b: (b, 0, 0)),
            scratch_shapes=[
                pltpu.VMEM((Cout, FLAT), jnp.bfloat16),          # stage-2 pad
            ],
        ),
        compiler_params=pltpu.CompilerParams(
            dimension_semantics=("parallel",),
            vmem_limit_bytes=48 * 1024 * 1024,
        ),
    )(xp, w1, b1, w2, b2, wse1, wse2)

    # Output is (N, Cout, H*PW) flat with row stride PW; drop the 2 junk
    # columns per row -> NCHW.
    return out.reshape(N, Cout, H, PW)[:, :, :, :W]


# ----------------------------------------------------------------------------
# Pure-JAX reference (mirrors the PyTorch forward, eval-mode BN, all f32)
# ----------------------------------------------------------------------------
def conv_block_reference(x, p):
    def conv(x, w, b):
        y = jax.lax.conv_general_dilated(
            x, w, (1, 1), "SAME",
            dimension_numbers=("NCHW", "OIHW", "NCHW"))
        return y + b[None, :, None, None]

    def bn(x, g, bta, m, v, eps=1e-5):
        return (x - m[None, :, None, None]) / jnp.sqrt(v + eps)[None, :, None, None] \
               * g[None, :, None, None] + bta[None, :, None, None]

    y = jax.nn.relu(bn(conv(x, p["conv1_w"], p["conv1_b"]),
                       p["bn1_gamma"], p["bn1_beta"], p["bn1_mean"], p["bn1_var"]))
    y = jax.nn.relu(bn(conv(y, p["conv2_w"], p["conv2_b"]),
                       p["bn2_gamma"], p["bn2_beta"], p["bn2_mean"], p["bn2_var"]))
    pooled = jnp.mean(y, axis=(2, 3))                            # (N, C)
    g = jax.nn.relu(pooled @ p["se_fc1_w"].T)
    g = jax.nn.sigmoid(g @ p["se_fc2_w"].T)                      # (N, C)
    return y * g[:, :, None, None]


# ----------------------------------------------------------------------------
# Main
# ----------------------------------------------------------------------------
if __name__ == "__main__":
    N, Cin, H, W = 2, 4, 16, 16
    Cout, red = 16, 8

    ks = jax.random.split(jax.random.PRNGKey(0), 15)

    params = {
        "conv1_w": 0.1 * jax.random.normal(ks[0], (Cout, Cin, 3, 3), jnp.float32),
        "conv1_b": 0.1 * jax.random.normal(ks[1], (Cout,), jnp.float32),
        "bn1_gamma": 1.0 + 0.1 * jax.random.normal(ks[2], (Cout,), jnp.float32),
        "bn1_beta": 0.1 * jax.random.normal(ks[3], (Cout,), jnp.float32),
        "bn1_mean": 0.1 * jax.random.normal(ks[4], (Cout,), jnp.float32),
        "bn1_var": jnp.abs(jax.random.normal(ks[5], (Cout,), jnp.float32)) + 0.5,
        "conv2_w": 0.1 * jax.random.normal(ks[6], (Cout, Cout, 3, 3), jnp.float32),
        "conv2_b": 0.1 * jax.random.normal(ks[7], (Cout,), jnp.float32),
        "bn2_gamma": 1.0 + 0.1 * jax.random.normal(ks[8], (Cout,), jnp.float32),
        "bn2_beta": 0.1 * jax.random.normal(ks[9], (Cout,), jnp.float32),
        "bn2_mean": 0.1 * jax.random.normal(ks[10], (Cout,), jnp.float32),
        "bn2_var": jnp.abs(jax.random.normal(ks[11], (Cout,), jnp.float32)) + 0.5,
        "se_fc1_w": 0.2 * jax.random.normal(ks[12], (Cout // red, Cout), jnp.float32),
        "se_fc2_w": 0.2 * jax.random.normal(ks[13], (Cout, Cout // red), jnp.float32),
    }

    x = jax.random.normal(ks[14], (N, Cin, H, W), jnp.float32)

    out = jax.block_until_ready(conv_block_forward(x, params))

    ref = conv_block_reference(x, params)
    assert out.shape == (N, Cout, H, W), out.shape
    max_err = float(jnp.max(jnp.abs(out - ref)))
    # Tolerance loosened vs the pure-f32 version: MXU operands are bf16
    # (epilogue / BN folding / SE stay f32), per the perf review.
    assert max_err < 5e-2, f"mismatch vs reference: {max_err}"

    print("KERNEL_OK")
</pallas_src>

<mosaic_0001>
module attributes {stable_mosaic.version = 11 : i64} {
  func.func @_conv_block_kernel(%arg0: i32, %arg1: memref<1x4x384xbf16, #tpu.memory_space<vmem>>, %arg2: memref<9x16x4xbf16, #tpu.memory_space<vmem>>, %arg3: memref<16x1xf32, #tpu.memory_space<vmem>>, %arg4: memref<9x16x16xbf16, #tpu.memory_space<vmem>>, %arg5: memref<16x1xf32, #tpu.memory_space<vmem>>, %arg6: memref<2x16xf32, #tpu.memory_space<vmem>>, %arg7: memref<16x2xf32, #tpu.memory_space<vmem>>, %arg8: memref<1x16x288xf32, #tpu.memory_space<vmem>>, %arg9: memref<16x384xbf16, #tpu.memory_space<vmem>>) attributes {dimension_semantics = [#tpu.dimension_semantics<parallel>], iteration_bounds = array<i64: 2>, scalar_prefetch = 0 : i64, scratch_operands = 1 : i64, tpu.core_type = #tpu.core_type<tc>, window_params = [{transform_indices = @transform_0, window_bounds = array<i64: 1, 4, 384>}, {pipeline_mode = #tpu.pipeline_mode<synchronous>, transform_indices = @transform_1, window_bounds = array<i64: 9, 16, 4>}, {pipeline_mode = #tpu.pipeline_mode<synchronous>, transform_indices = @transform_2, window_bounds = array<i64: 16, 1>}, {pipeline_mode = #tpu.pipeline_mode<synchronous>, transform_indices = @transform_3, window_bounds = array<i64: 9, 16, 16>}, {pipeline_mode = #tpu.pipeline_mode<synchronous>, transform_indices = @transform_4, window_bounds = array<i64: 16, 1>}, {pipeline_mode = #tpu.pipeline_mode<synchronous>, transform_indices = @transform_5, window_bounds = array<i64: 2, 16>}, {pipeline_mode = #tpu.pipeline_mode<synchronous>, transform_indices = @transform_6, window_bounds = array<i64: 16, 2>}, {transform_indices = @transform_7, window_bounds = array<i64: 1, 16, 288>}]} {
    %0 = tpu.iota {dimensions = array<i32: 1>} : vector<1x288xi32>
    %c18_i32 = arith.constant 18 : i32
    %c0_i32 = arith.constant 0 : i32
    %1 = arith.cmpi eq, %c18_i32, %c0_i32 : i32
    %c1_i32 = arith.constant 1 : i32
    %2 = arith.select %1, %c1_i32, %c18_i32 : i32
    %3 = vector.broadcast %2 : i32 to vector<1x288xi32>
    %4 = arith.remsi %0, %3 : vector<1x288xi32>
    %c0_i32_0 = arith.constant 0 : i32
    %5 = vector.broadcast %c0_i32_0 : i32 to vector<1x288xi32>
    %6 = arith.cmpi ne, %4, %5 : vector<1x288xi32>
    %c0_i32_1 = arith.constant 0 : i32
    %7 = vector.broadcast %c0_i32_1 : i32 to vector<1x288xi32>
    %8 = arith.cmpi slt, %4, %7 : vector<1x288xi32>
    %c0_i32_2 = arith.constant 0 : i32
    %9 = arith.cmpi slt, %2, %c0_i32_2 : i32
    %10 = vector.broadcast %9 : i1 to vector<1x288xi1>
    %11 = vector.broadcast %10 : vector<1x288xi1> to vector<1x288xi1>
    %12 = arith.xori %8, %11 : vector<1x288xi1>
    %13 = arith.andi %12, %6 : vector<1x288xi1>
    %14 = vector.broadcast %2 : i32 to vector<1x288xi32>
    %15 = arith.addi %4, %14 : vector<1x288xi32>
    %16 = arith.select %13, %15, %4 : vector<1x288xi1>, vector<1x288xi32>
    %c16_i32 = arith.constant 16 : i32
    %17 = vector.broadcast %c16_i32 : i32 to vector<1x288xi32>
    %18 = arith.cmpi slt, %16, %17 : vector<1x288xi32>
    %cst = arith.constant 0.000000e+00 : f32
    %19 = vector.broadcast %cst : f32 to vector<16x288xf32>
    %c0 = arith.constant 0 : index
    %c0_3 = arith.constant 0 : index
    %c0_4 = arith.constant 0 : index
    %20 = vector.load %arg1[%c0, %c0_3, %c0_4] : memref<1x4x384xbf16, #tpu.memory_space<vmem>>, vector<1x4x288xbf16>
    %21 = vector.shape_cast %20 : vector<1x4x288xbf16> to vector<4x288xbf16>
    %c0_5 = arith.constant 0 : index
    %c0_6 = arith.constant 0 : index
    %c0_7 = arith.constant 0 : index
    %22 = vector.load %arg2[%c0_5, %c0_6, %c0_7] : memref<9x16x4xbf16, #tpu.memory_space<vmem>>, vector<1x16x4xbf16>
    %23 = vector.shape_cast %22 : vector<1x16x4xbf16> to vector<16x4xbf16>
    %cst_8 = arith.constant dense<0.000000e+00> : vector<16x288xf32>
    %24 = tpu.matmul %23, %21, %cst_8 {dimension_numbers = #tpu.dot_dimension_numbers<[1], [0], [0], [1], [0, 0, 1, 1], [], []>} : vector<16x4xbf16>, vector<4x288xbf16>, vector<16x288xf32> -> vector<16x288xf32>
    %25 = arith.addf %19, %24 : vector<16x288xf32>
    %c0_9 = arith.constant 0 : index
    %c0_10 = arith.constant 0 : index
    %c1 = arith.constant 1 : index
    %26 = vector.load %arg1[%c0_9, %c0_10, %c1] : memref<1x4x384xbf16, #tpu.memory_space<vmem>>, vector<1x4x288xbf16>
    %27 = vector.shape_cast %26 : vector<1x4x288xbf16> to vector<4x288xbf16>
    %c1_11 = arith.constant 1 : index
    %c0_12 = arith.constant 0 : index
    %c0_13 = arith.constant 0 : index
    %28 = vector.load %arg2[%c1_11, %c0_12, %c0_13] : memref<9x16x4xbf16, #tpu.memory_space<vmem>>, vector<1x16x4xbf16>
    %29 = vector.shape_cast %28 : vector<1x16x4xbf16> to vector<16x4xbf16>
    %cst_14 = arith.constant dense<0.000000e+00> : vector<16x288xf32>
    %30 = tpu.matmul %29, %27, %cst_14 {dimension_numbers = #tpu.dot_dimension_numbers<[1], [0], [0], [1], [0, 0, 1, 1], [], []>} : vector<16x4xbf16>, vector<4x288xbf16>, vector<16x288xf32> -> vector<16x288xf32>
    %31 = arith.addf %25, %30 : vector<16x288xf32>
    %c0_15 = arith.constant 0 : index
    %c0_16 = arith.constant 0 : index
    %c2 = arith.constant 2 : index
    %32 = vector.load %arg1[%c0_15, %c0_16, %c2] : memref<1x4x384xbf16, #tpu.memory_space<vmem>>, vector<1x4x288xbf16>
    %33 = vector.shape_cast %32 : vector<1x4x288xbf16> to vector<4x288xbf16>
    %c2_17 = arith.constant 2 : index
    %c0_18 = arith.constant 0 : index
    %c0_19 = arith.constant 0 : index
    %34 = vector.load %arg2[%c2_17, %c0_18, %c0_19] : memref<9x16x4xbf16, #tpu.memory_space<vmem>>, vector<1x16x4xbf16>
    %35 = vector.shape_cast %34 : vector<1x16x4xbf16> to vector<16x4xbf16>
    %cst_20 = arith.constant dense<0.000000e+00> : vector<16x288xf32>
    %36 = tpu.matmul %35, %33, %cst_20 {dimension_numbers = #tpu.dot_dimension_numbers<[1], [0], [0], [1], [0, 0, 1, 1], [], []>} : vector<16x4xbf16>, vector<4x288xbf16>, vector<16x288xf32> -> vector<16x288xf32>
    %37 = arith.addf %31, %36 : vector<16x288xf32>
    %c0_21 = arith.constant 0 : index
    %c0_22 = arith.constant 0 : index
    %c18 = arith.constant 18 : index
    %38 = vector.load %arg1[%c0_21, %c0_22, %c18] : memref<1x4x384xbf16, #tpu.memory_space<vmem>>, vector<1x4x288xbf16>
    %39 = vector.shape_cast %38 : vector<1x4x288xbf16> to vector<4x288xbf16>
    %c3 = arith.constant 3 : index
    %c0_23 = arith.constant 0 : index
    %c0_24 = arith.constant 0 : index
    %40 = vector.load %arg2[%c3, %c0_23, %c0_24] : memref<9x16x4xbf16, #tpu.memory_space<vmem>>, vector<1x16x4xbf16>
    %41 = vector.shape_cast %40 : vector<1x16x4xbf16> to vector<16x4xbf16>
    %cst_25 = arith.constant dense<0.000000e+00> : vector<16x288xf32>
    %42 = tpu.matmul %41, %39, %cst_25 {dimension_numbers = #tpu.dot_dimension_numbers<[1], [0], [0], [1], [0, 0, 1, 1], [], []>} : vector<16x4xbf16>, vector<4x288xbf16>, vector<16x288xf32> -> vector<16x288xf32>
    %43 = arith.addf %37, %42 : vector<16x288xf32>
    %c0_26 = arith.constant 0 : index
    %c0_27 = arith.constant 0 : index
    %c19 = arith.constant 19 : index
    %44 = vector.load %arg1[%c0_26, %c0_27, %c19] : memref<1x4x384xbf16, #tpu.memory_space<vmem>>, vector<1x4x288xbf16>
    %45 = vector.shape_cast %44 : vector<1x4x288xbf16> to vector<4x288xbf16>
    %c4 = arith.constant 4 : index
    %c0_28 = arith.constant 0 : index
    %c0_29 = arith.constant 0 : index
    %46 = vector.load %arg2[%c4, %c0_28, %c0_29] : memref<9x16x4xbf16, #tpu.memory_space<vmem>>, vector<1x16x4xbf16>
    %47 = vector.shape_cast %46 : vector<1x16x4xbf16> to vector<16x4xbf16>
    %cst_30 = arith.constant dense<0.000000e+00> : vector<16x288xf32>
    %48 = tpu.matmul %47, %45, %cst_30 {dimension_numbers = #tpu.dot_dimension_numbers<[1], [0], [0], [1], [0, 0, 1, 1], [], []>} : vector<16x4xbf16>, vector<4x288xbf16>, vector<16x288xf32> -> vector<16x288xf32>
    %49 = arith.addf %43, %48 : vector<16x288xf32>
    %c0_31 = arith.constant 0 : index
    %c0_32 = arith.constant 0 : index
    %c20 = arith.constant 20 : index
    %50 = vector.load %arg1[%c0_31, %c0_32, %c20] : memref<1x4x384xbf16, #tpu.memory_space<vmem>>, vector<1x4x288xbf16>
    %51 = vector.shape_cast %50 : vector<1x4x288xbf16> to vector<4x288xbf16>
    %c5 = arith.constant 5 : index
    %c0_33 = arith.constant 0 : index
    %c0_34 = arith.constant 0 : index
    %52 = vector.load %arg2[%c5, %c0_33, %c0_34] : memref<9x16x4xbf16, #tpu.memory_space<vmem>>, vector<1x16x4xbf16>
    %53 = vector.shape_cast %52 : vector<1x16x4xbf16> to vector<16x4xbf16>
    %cst_35 = arith.constant dense<0.000000e+00> : vector<16x288xf32>
    %54 = tpu.matmul %53, %51, %cst_35 {dimension_numbers = #tpu.dot_dimension_numbers<[1], [0], [0], [1], [0, 0, 1, 1], [], []>} : vector<16x4xbf16>, vector<4x288xbf16>, vector<16x288xf32> -> vector<16x288xf32>
    %55 = arith.addf %49, %54 : vector<16x288xf32>
    %c0_36 = arith.constant 0 : index
    %c0_37 = arith.constant 0 : index
    %c36 = arith.constant 36 : index
    %56 = vector.load %arg1[%c0_36, %c0_37, %c36] : memref<1x4x384xbf16, #tpu.memory_space<vmem>>, vector<1x4x288xbf16>
    %57 = vector.shape_cast %56 : vector<1x4x288xbf16> to vector<4x288xbf16>
    %c6 = arith.constant 6 : index
    %c0_38 = arith.constant 0 : index
    %c0_39 = arith.constant 0 : index
    %58 = vector.load %arg2[%c6, %c0_38, %c0_39] : memref<9x16x4xbf16, #tpu.memory_space<vmem>>, vector<1x16x4xbf16>
    %59 = vector.shape_cast %58 : vector<1x16x4xbf16> to vector<16x4xbf16>
    %cst_40 = arith.constant dense<0.000000e+00> : vector<16x288xf32>
    %60 = tpu.matmul %59, %57, %cst_40 {dimension_numbers = #tpu.dot_dimension_numbers<[1], [0], [0], [1], [0, 0, 1, 1], [], []>} : vector<16x4xbf16>, vector<4x288xbf16>, vector<16x288xf32> -> vector<16x288xf32>
    %61 = arith.addf %55, %60 : vector<16x288xf32>
    %c0_41 = arith.constant 0 : index
    %c0_42 = arith.constant 0 : index
    %c37 = arith.constant 37 : index
    %62 = vector.load %arg1[%c0_41, %c0_42, %c37] : memref<1x4x384xbf16, #tpu.memory_space<vmem>>, vector<1x4x288xbf16>
    %63 = vector.shape_cast %62 : vector<1x4x288xbf16> to vector<4x288xbf16>
    %c7 = arith.constant 7 : index
    %c0_43 = arith.constant 0 : index
    %c0_44 = arith.constant 0 : index
    %64 = vector.load %arg2[%c7, %c0_43, %c0_44] : memref<9x16x4xbf16, #tpu.memory_space<vmem>>, vector<1x16x4xbf16>
    %65 = vector.shape_cast %64 : vector<1x16x4xbf16> to vector<16x4xbf16>
    %cst_45 = arith.constant dense<0.000000e+00> : vector<16x288xf32>
    %66 = tpu.matmul %65, %63, %cst_45 {dimension_numbers = #tpu.dot_dimension_numbers<[1], [0], [0], [1], [0, 0, 1, 1], [], []>} : vector<16x4xbf16>, vector<4x288xbf16>, vector<16x288xf32> -> vector<16x288xf32>
    %67 = arith.addf %61, %66 : vector<16x288xf32>
    %c0_46 = arith.constant 0 : index
    %c0_47 = arith.constant 0 : index
    %c38 = arith.constant 38 : index
    %68 = vector.load %arg1[%c0_46, %c0_47, %c38] : memref<1x4x384xbf16, #tpu.memory_space<vmem>>, vector<1x4x288xbf16>
    %69 = vector.shape_cast %68 : vector<1x4x288xbf16> to vector<4x288xbf16>
    %c8 = arith.constant 8 : index
    %c0_48 = arith.constant 0 : index
    %c0_49 = arith.constant 0 : index
    %70 = vector.load %arg2[%c8, %c0_48, %c0_49] : memref<9x16x4xbf16, #tpu.memory_space<vmem>>, vector<1x16x4xbf16>
    %71 = vector.shape_cast %70 : vector<1x16x4xbf16> to vector<16x4xbf16>
    %cst_50 = arith.constant dense<0.000000e+00> : vector<16x288xf32>
    %72 = tpu.matmul %71, %69, %cst_50 {dimension_numbers = #tpu.dot_dimension_numbers<[1], [0], [0], [1], [0, 0, 1, 1], [], []>} : vector<16x4xbf16>, vector<4x288xbf16>, vector<16x288xf32> -> vector<16x288xf32>
    %73 = arith.addf %67, %72 : vector<16x288xf32>
    %c0_51 = arith.constant 0 : index
    %c0_52 = arith.constant 0 : index
    %74 = vector.load %arg3[%c0_51, %c0_52] : memref<16x1xf32, #tpu.memory_space<vmem>>, vector<16x1xf32>
    %75 = vector.broadcast %74 : vector<16x1xf32> to vector<16x288xf32>
    %76 = arith.addf %73, %75 : vector<16x288xf32>
    %cst_53 = arith.constant 0.000000e+00 : f32
    %77 = vector.broadcast %cst_53 : f32 to vector<16x288xf32>
    %78 = arith.maximumf %76, %77 : vector<16x288xf32>
    %cst_54 = arith.constant 0.000000e+00 : f32
    %79 = vector.shape_cast %18 : vector<1x288xi1> to vector<1x288xi1>
    %80 = vector.broadcast %79 : vector<1x288xi1> to vector<16x288xi1>
    %81 = vector.broadcast %cst_54 : f32 to vector<16x288xf32>
    %82 = arith.select %80, %78, %81 : vector<16x288xi1>, vector<16x288xf32>
    %cst_55 = arith.constant 0.000000e+00 : bf16
    %83 = vector.broadcast %cst_55 : bf16 to vector<16x19xbf16>
    %c0_56 = arith.constant 0 : index
    %c0_57 = arith.constant 0 : index
    %84 = vector.load %arg9[%c0_56, %c0_57] : memref<16x384xbf16, #tpu.memory_space<vmem>>, vector<16x19xbf16>
    tpu.vector_store %arg9[%c0_56, %c0_57], %83 {strides = array<i32>} : memref<16x384xbf16, #tpu.memory_space<vmem>>, vector<16x19xbf16>,
    %cst_58 = arith.constant 0.000000e+00 : bf16
    %85 = vector.broadcast %cst_58 : bf16 to vector<16x77xbf16>
    %c0_59 = arith.constant 0 : index
    %c307 = arith.constant 307 : index
    %86 = vector.load %arg9[%c0_59, %c307] : memref<16x384xbf16, #tpu.memory_space<vmem>>, vector<16x77xbf16>
    tpu.vector_store %arg9[%c0_59, %c307], %85 {strides = array<i32>} : memref<16x384xbf16, #tpu.memory_space<vmem>>, vector<16x77xbf16>,
    %87 = arith.truncf %82 : vector<16x288xf32> to vector<16x288xbf16>
    %c0_60 = arith.constant 0 : index
    %c19_61 = arith.constant 19 : index
    %88 = vector.load %arg9[%c0_60, %c19_61] : memref<16x384xbf16, #tpu.memory_space<vmem>>, vector<16x288xbf16>
    tpu.vector_store %arg9[%c0_60, %c19_61], %87 {strides = array<i32>} : memref<16x384xbf16, #tpu.memory_space<vmem>>, vector<16x288xbf16>,
    %cst_62 = arith.constant 0.000000e+00 : f32
    %89 = vector.broadcast %cst_62 : f32 to vector<16x288xf32>
    %c0_63 = arith.constant 0 : index
    %c0_64 = arith.constant 0 : index
    %90 = vector.load %arg9[%c0_63, %c0_64] : memref<16x384xbf16, #tpu.memory_space<vmem>>, vector<16x288xbf16>
    %c0_65 = arith.constant 0 : index
    %c0_66 = arith.constant 0 : index
    %c0_67 = arith.constant 0 : index
    %91 = vector.load %arg4[%c0_65, %c0_66, %c0_67] : memref<9x16x16xbf16, #tpu.memory_space<vmem>>, vector<1x16x16xbf16>
    %92 = vector.shape_cast %91 : vector<1x16x16xbf16> to vector<16x16xbf16>
    %cst_68 = arith.constant dense<0.000000e+00> : vector<16x288xf32>
    %93 = tpu.matmul %92, %90, %cst_68 {dimension_numbers = #tpu.dot_dimension_numbers<[1], [0], [0], [1], [0, 0, 1, 1], [], []>} : vector<16x16xbf16>, vector<16x288xbf16>, vector<16x288xf32> -> vector<16x288xf32>
    %94 = arith.addf %89, %93 : vector<16x288xf32>
    %c0_69 = arith.constant 0 : index
    %c1_70 = arith.constant 1 : index
    %95 = vector.load %arg9[%c0_69, %c1_70] : memref<16x384xbf16, #tpu.memory_space<vmem>>, vector<16x288xbf16>
    %c1_71 = arith.constant 1 : index
    %c0_72 = arith.constant 0 : index
    %c0_73 = arith.constant 0 : index
    %96 = vector.load %arg4[%c1_71, %c0_72, %c0_73] : memref<9x16x16xbf16, #tpu.memory_space<vmem>>, vector<1x16x16xbf16>
    %97 = vector.shape_cast %96 : vector<1x16x16xbf16> to vector<16x16xbf16>
    %cst_74 = arith.constant dense<0.000000e+00> : vector<16x288xf32>
    %98 = tpu.matmul %97, %95, %cst_74 {dimension_numbers = #tpu.dot_dimension_numbers<[1], [0], [0], [1], [0, 0, 1, 1], [], []>} : vector<16x16xbf16>, vector<16x288xbf16>, vector<16x288xf32> -> vector<16x288xf32>
    %99 = arith.addf %94, %98 : vector<16x288xf32>
    %c0_75 = arith.constant 0 : index
    %c2_76 = arith.constant 2 : index
    %100 = vector.load %arg9[%c0_75, %c2_76] : memref<16x384xbf16, #tpu.memory_space<vmem>>, vector<16x288xbf16>
    %c2_77 = arith.constant 2 : index
    %c0_78 = arith.constant 0 : index
    %c0_79 = arith.constant 0 : index
    %101 = vector.load %arg4[%c2_77, %c0_78, %c0_79] : memref<9x16x16xbf16, #tpu.memory_space<vmem>>, vector<1x16x16xbf16>
    %102 = vector.shape_cast %101 : vector<1x16x16xbf16> to vector<16x16xbf16>
    %cst_80 = arith.constant dense<0.000000e+00> : vector<16x288xf32>
    %103 = tpu.matmul %102, %100, %cst_80 {dimension_numbers = #tpu.dot_dimension_numbers<[1], [0], [0], [1], [0, 0, 1, 1], [], []>} : vector<16x16xbf16>, vector<16x288xbf16>, vector<16x288xf32> -> vector<16x288xf32>
    %104 = arith.addf %99, %103 : vector<16x288xf32>
    %c0_81 = arith.constant 0 : index
    %c18_82 = arith.constant 18 : index
    %105 = vector.load %arg9[%c0_81, %c18_82] : memref<16x384xbf16, #tpu.memory_space<vmem>>, vector<16x288xbf16>
    %c3_83 = arith.constant 3 : index
    %c0_84 = arith.constant 0 : index
    %c0_85 = arith.constant 0 : index
    %106 = vector.load %arg4[%c3_83, %c0_84, %c0_85] : memref<9x16x16xbf16, #tpu.memory_space<vmem>>, vector<1x16x16xbf16>
    %107 = vector.shape_cast %106 : vector<1x16x16xbf16> to vector<16x16xbf16>
    %cst_86 = arith.constant dense<0.000000e+00> : vector<16x288xf32>
    %108 = tpu.matmul %107, %105, %cst_86 {dimension_numbers = #tpu.dot_dimension_numbers<[1], [0], [0], [1], [0, 0, 1, 1], [], []>} : vector<16x16xbf16>, vector<16x288xbf16>, vector<16x288xf32> -> vector<16x288xf32>
    %109 = arith.addf %104, %108 : vector<16x288xf32>
    %c0_87 = arith.constant 0 : index
    %c19_88 = arith.constant 19 : index
    %110 = vector.load %arg9[%c0_87, %c19_88] : memref<16x384xbf16, #tpu.memory_space<vmem>>, vector<16x288xbf16>
    %c4_89 = arith.constant 4 : index
    %c0_90 = arith.constant 0 : index
    %c0_91 = arith.constant 0 : index
    %111 = vector.load %arg4[%c4_89, %c0_90, %c0_91] : memref<9x16x16xbf16, #tpu.memory_space<vmem>>, vector<1x16x16xbf16>
    %112 = vector.shape_cast %111 : vector<1x16x16xbf16> to vector<16x16xbf16>
    %cst_92 = arith.constant dense<0.000000e+00> : vector<16x288xf32>
    %113 = tpu.matmul %112, %110, %cst_92 {dimension_numbers = #tpu.dot_dimension_numbers<[1], [0], [0], [1], [0, 0, 1, 1], [], []>} : vector<16x16xbf16>, vector<16x288xbf16>, vector<16x288xf32> -> vector<16x288xf32>
    %114 = arith.addf %109, %113 : vector<16x288xf32>
    %c0_93 = arith.constant 0 : index
    %c20_94 = arith.constant 20 : index
    %115 = vector.load %arg9[%c0_93, %c20_94] : memref<16x384xbf16, #tpu.memory_space<vmem>>, vector<16x288xbf16>
    %c5_95 = arith.constant 5 : index
    %c0_96 = arith.constant 0 : index
    %c0_97 = arith.constant 0 : index
    %116 = vector.load %arg4[%c5_95, %c0_96, %c0_97] : memref<9x16x16xbf16, #tpu.memory_space<vmem>>, vector<1x16x16xbf16>
    %117 = vector.shape_cast %116 : vector<1x16x16xbf16> to vector<16x16xbf16>
    %cst_98 = arith.constant dense<0.000000e+00> : vector<16x288xf32>
    %118 = tpu.matmul %117, %115, %cst_98 {dimension_numbers = #tpu.dot_dimension_numbers<[1], [0], [0], [1], [0, 0, 1, 1], [], []>} : vector<16x16xbf16>, vector<16x288xbf16>, vector<16x288xf32> -> vector<16x288xf32>
    %119 = arith.addf %114, %118 : vector<16x288xf32>
    %c0_99 = arith.constant 0 : index
    %c36_100 = arith.constant 36 : index
    %120 = vector.load %arg9[%c0_99, %c36_100] : memref<16x384xbf16, #tpu.memory_space<vmem>>, vector<16x288xbf16>
    %c6_101 = arith.constant 6 : index
    %c0_102 = arith.constant 0 : index
    %c0_103 = arith.constant 0 : index
    %121 = vector.load %arg4[%c6_101, %c0_102, %c0_103] : memref<9x16x16xbf16, #tpu.memory_space<vmem>>, vector<1x16x16xbf16>
    %122 = vector.shape_cast %121 : vector<1x16x16xbf16> to vector<16x16xbf16>
    %cst_104 = arith.constant dense<0.000000e+00> : vector<16x288xf32>
    %123 = tpu.matmul %122, %120, %cst_104 {dimension_numbers = #tpu.dot_dimension_numbers<[1], [0], [0], [1], [0, 0, 1, 1], [], []>} : vector<16x16xbf16>, vector<16x288xbf16>, vector<16x288xf32> -> vector<16x288xf32>
    %124 = arith.addf %119, %123 : vector<16x288xf32>
    %c0_105 = arith.constant 0 : index
    %c37_106 = arith.constant 37 : index
    %125 = vector.load %arg9[%c0_105, %c37_106] : memref<16x384xbf16, #tpu.memory_space<vmem>>, vector<16x288xbf16>
    %c7_107 = arith.constant 7 : index
    %c0_108 = arith.constant 0 : index
    %c0_109 = arith.constant 0 : index
    %126 = vector.load %arg4[%c7_107, %c0_108, %c0_109] : memref<9x16x16xbf16, #tpu.memory_space<vmem>>, vector<1x16x16xbf16>
    %127 = vector.shape_cast %126 : vector<1x16x16xbf16> to vector<16x16xbf16>
    %cst_110 = arith.constant dense<0.000000e+00> : vector<16x288xf32>
    %128 = tpu.matmul %127, %125, %cst_110 {dimension_numbers = #tpu.dot_dimension_numbers<[1], [0], [0], [1], [0, 0, 1, 1], [], []>} : vector<16x16xbf16>, vector<16x288xbf16>, vector<16x288xf32> -> vector<16x288xf32>
    %129 = arith.addf %124, %128 : vector<16x288xf32>
    %c0_111 = arith.constant 0 : index
    %c38_112 = arith.constant 38 : index
    %130 = vector.load %arg9[%c0_111, %c38_112] : memref<16x384xbf16, #tpu.memory_space<vmem>>, vector<16x288xbf16>
    %c8_113 = arith.constant 8 : index
    %c0_114 = arith.constant 0 : index
    %c0_115 = arith.constant 0 : index
    %131 = vector.load %arg4[%c8_113, %c0_114, %c0_115] : memref<9x16x16xbf16, #tpu.memory_space<vmem>>, vector<1x16x16xbf16>
    %132 = vector.shape_cast %131 : vector<1x16x16xbf16> to vector<16x16xbf16>
    %cst_116 = arith.constant dense<0.000000e+00> : vector<16x288xf32>
    %133 = tpu.matmul %132, %130, %cst_116 {dimension_numbers = #tpu.dot_dimension_numbers<[1], [0], [0], [1], [0, 0, 1, 1], [], []>} : vector<16x16xbf16>, vector<16x288xbf16>, vector<16x288xf32> -> vector<16x288xf32>
    %134 = arith.addf %129, %133 : vector<16x288xf32>
    %c0_117 = arith.constant 0 : index
    %c0_118 = arith.constant 0 : index
    %135 = vector.load %arg5[%c0_117, %c0_118] : memref<16x1xf32, #tpu.memory_space<vmem>>, vector<16x1xf32>
    %136 = vector.broadcast %135 : vector<16x1xf32> to vector<16x288xf32>
    %137 = arith.addf %134, %136 : vector<16x288xf32>
    %cst_119 = arith.constant 0.000000e+00 : f32
    %138 = vector.broadcast %cst_119 : f32 to vector<16x288xf32>
    %139 = arith.maximumf %137, %138 : vector<16x288xf32>
    %cst_120 = arith.constant 0.000000e+00 : f32
    %140 = vector.shape_cast %18 : vector<1x288xi1> to vector<1x288xi1>
    %141 = vector.broadcast %140 : vector<1x288xi1> to vector<16x288xi1>
    %142 = vector.broadcast %cst_120 : f32 to vector<16x288xf32>
    %143 = arith.select %141, %139, %142 : vector<16x288xi1>, vector<16x288xf32>
    %cst_121 = arith.constant dense<0.000000e+00> : vector<16xf32>
    %144 = vector.multi_reduction <add>, %143, %cst_121 [1] : vector<16x288xf32> to vector<16xf32>
    %145 = vector.shape_cast %144 : vector<16xf32> to vector<16x1xf32>
    %cst_122 = arith.constant 3.906250e-03 : f32
    %146 = vector.broadcast %cst_122 : f32 to vector<16x1xf32>
    %147 = arith.mulf %145, %146 : vector<16x1xf32>
    %c0_123 = arith.constant 0 : index
    %c0_124 = arith.constant 0 : index
    %148 = vector.load %arg6[%c0_123, %c0_124] : memref<2x16xf32, #tpu.memory_space<vmem>>, vector<2x16xf32>
    %cst_125 = arith.constant dense<0.000000e+00> : vector<2x1xf32>
    %149 = tpu.matmul %148, %147, %cst_125 {dimension_numbers = #tpu.dot_dimension_numbers<[1], [0], [0], [1], [0, 0, 1, 1], [], []>} : vector<2x16xf32>, vector<16x1xf32>, vector<2x1xf32> -> vector<2x1xf32>
    %cst_126 = arith.constant 0.000000e+00 : f32
    %150 = vector.broadcast %cst_126 : f32 to vector<2x1xf32>
    %151 = arith.maximumf %149, %150 : vector<2x1xf32>
    %c0_127 = arith.constant 0 : index
    %c0_128 = arith.constant 0 : index
    %152 = vector.load %arg7[%c0_127, %c0_128] : memref<16x2xf32, #tpu.memory_space<vmem>>, vector<16x2xf32>
    %cst_129 = arith.constant dense<0.000000e+00> : vector<16x1xf32>
    %153 = tpu.matmul %152, %151, %cst_129 {dimension_numbers = #tpu.dot_dimension_numbers<[1], [0], [0], [1], [0, 0, 1, 1], [], []>} : vector<16x2xf32>, vector<2x1xf32>, vector<16x1xf32> -> vector<16x1xf32>
    %154 = arith.negf %153 : vector<16x1xf32>
    %155 = math.exp %154 : vector<16x1xf32>
    %cst_130 = arith.constant 1.000000e+00 : f32
    %156 = vector.broadcast %cst_130 : f32 to vector<16x1xf32>
    %157 = arith.addf %156, %155 : vector<16x1xf32>
    %158 = arith.divf %156, %157 : vector<16x1xf32>
    %159 = vector.broadcast %158 : vector<16x1xf32> to vector<16x288xf32>
    %160 = arith.mulf %143, %159 : vector<16x288xf32>
    %c0_131 = arith.constant 0 : index
    %c0_132 = arith.constant 0 : index
    %c0_133 = arith.constant 0 : index
    %161 = vector.load %arg8[%c0_131, %c0_132, %c0_133] : memref<1x16x288xf32, #tpu.memory_space<vmem>>, vector<1x16x288xf32>
    %162 = vector.shape_cast %161 : vector<1x16x288xf32> to vector<16x288xf32>
    %163 = vector.shape_cast %160 : vector<16x288xf32> to vector<1x16x288xf32>
    tpu.vector_store %arg8[%c0_131, %c0_132, %c0_133], %163 {strides = array<i32>} : memref<1x16x288xf32, #tpu.memory_space<vmem>>, vector<1x16x288xf32>,
    return
  }
  func.func @transform_0(%arg0: i32) -> (i32, i32, i32) {
    %c0_i32 = arith.constant 0 : i32
    %c0_i32_0 = arith.constant 0 : i32
    %c0_i32_1 = arith.constant 0 : i32
    return %arg0, %c0_i32, %c0_i32_0 : i32, i32, i32
  }
  func.func @transform_1(%arg0: i32) -> (i32, i32, i32) {
    %c0_i32 = arith.constant 0 : i32
    %c0_i32_0 = arith.constant 0 : i32
    %c0_i32_1 = arith.constant 0 : i32
    %c0_i32_2 = arith.constant 0 : i32
    return %c0_i32, %c0_i32_0, %c0_i32_1 : i32, i32, i32
  }
  func.func @transform_2(%arg0: i32) -> (i32, i32) {
    %c0_i32 = arith.constant 0 : i32
    %c0_i32_0 = arith.constant 0 : i32
    %c0_i32_1 = arith.constant 0 : i32
    return %c0_i32, %c0_i32_0 : i32, i32
  }
  func.func @transform_3(%arg0: i32) -> (i32, i32, i32) {
    %c0_i32 = arith.constant 0 : i32
    %c0_i32_0 = arith.constant 0 : i32
    %c0_i32_1 = arith.constant 0 : i32
    %c0_i32_2 = arith.constant 0 : i32
    return %c0_i32, %c0_i32_0, %c0_i32_1 : i32, i32, i32
  }
  func.func @transform_4(%arg0: i32) -> (i32, i32) {
    %c0_i32 = arith.constant 0 : i32
    %c0_i32_0 = arith.constant 0 : i32
    %c0_i32_1 = arith.constant 0 : i32
    return %c0_i32, %c0_i32_0 : i32, i32
  }
  func.func @transform_5(%arg0: i32) -> (i32, i32) {
    %c0_i32 = arith.constant 0 : i32
    %c0_i32_0 = arith.constant 0 : i32
    %c0_i32_1 = arith.constant 0 : i32
    return %c0_i32, %c0_i32_0 : i32, i32
  }
  func.func @transform_6(%arg0: i32) -> (i32, i32) {
    %c0_i32 = arith.constant 0 : i32
    %c0_i32_0 = arith.constant 0 : i32
    %c0_i32_1 = arith.constant 0 : i32
    return %c0_i32, %c0_i32_0 : i32, i32
  }
  func.func @transform_7(%arg0: i32) -> (i32, i32, i32) {
    %c0_i32 = arith.constant 0 : i32
    %c0_i32_0 = arith.constant 0 : i32
    %c0_i32_1 = arith.constant 0 : i32
    return %arg0, %c0_i32, %c0_i32_0 : i32, i32, i32
  }
}

</mosaic_0001>

<bundles_post_ra>
// kernel: tpu_custom_call.1
= control target key start
LH: loop header
LB: loop body
LE: loop exit
PB: predicated region body
PF: predicated region fallthrough
CT: control target
= control target key end

     0   :  { %12 = vsyncpa [#allocation4], 0  ;;  %s3971_s0 = inlined_call_operand.vmem [shape: bf16[2,4,384], index: 0, kind: input, shape index: {}]   ;;  %s3972_s1 = inlined_call_operand.vmem [shape: bf16[9,16,4], index: 1, kind: input, shape index: {}]   ;;  %s3973_s2 = inlined_call_operand.vmem [shape: f32[16,1], index: 2, kind: input, shape index: {}]   ;;  %s3974_s3 = inlined_call_operand.vmem [shape: bf16[9,16,16], index: 3, kind: input, shape index: {}]   ;;  %s3975_s4 = inlined_call_operand.vmem [shape: f32[16,1], index: 4, kind: input, shape index: {}]   ;;  %s3976_s5 = inlined_call_operand.vmem [shape: f32[2,16], index: 5, kind: input, shape index: {}]   ;;  %s3977_s6 = inlined_call_operand.vmem [shape: f32[16,2], index: 6, kind: input, shape index: {}]   ;;  %s3978_s7 = inlined_call_operand.hbm [shape: f32[2,16,288], index: 7, kind: output, shape index: {}]  }
   0x1   :  { %14 = vsyncpa [#allocation4 + $0x1], 0  ;;  %s3456_s24 = smov 0   ;;  %s3458_s25 = smov 0  }
   0x2   :  { %s3460_s26 = smov 0   ;;  %s3462_s27 = smov 0  }
   0x3 LB: > { %s3477_s28 = sadd.s32 4294967295, %s3397_s27   ;;  %s2897_s29 = sadd.s32 4294967294, %s3397_s27   ;;  %s3397_s27 = sphi %s3462_s27, %s4001_s27   ;;  %s3393_s26 = sphi %s3460_s26, %s4000_s26   ;;  %s3389_s25 = sphi %s3458_s25, %s3999_s25   ;;  %s3385_s24 = sphi %s3456_s24, %s3998_s24  }
   0x4   : > { %s3481_s30 = sadd.s32 1, %s3397_s27   ;;  %s179_s8 = sadd.s32 1, %s3393_s26 }
   0x5   : > { %s176_s9 = ssub.s32 %s3397_s27, %s3481_s30  ;;  %p189_p0 = scmp.ne.s32.totalorder %s3393_s26, %s3389_s25 }
   0x6   : > { %p177_p1 = scmp.eq.s32.totalorder %s176_s9, 0  ;;  %p190_p2 = scmp.eq.s32.totalorder %s3477_s28, 1 }
   0x7   : > { %p195_p3 = scmp.ne.s32.totalorder %s3389_s25, %s3385_s24  ;;  %p196_p4 = scmp.eq.s32.totalorder %s2897_s29, 1 }
   0x8   : > { %s3492_s10 = scalar_select %p177_p1, %s3393_s26, %s179_s8  }
   0x9   : > { %p3494_p5 = por %p190_p2, %p189_p0  ;;  %p3498_p6 = por %p196_p4, %p195_p3 }
   0xa   : > { %p2900_p7 = scmp.ge.s32.totalorder %s3397_s27, 1  ;;  %p240_p8 = scmp.lt.s32.totalorder %s3397_s27, 3 }
   0xc   : > { %p241_p9 = pnand %p2900_p7, %p240_p8 }
   0xd   : > { %p272_p10 = scmp.lt.s32.totalorder (!%p241_p9), %s3477_s28, 1  ;;  %v278_v0 = vlaneseq (!%p241_p9)  ;;  %v3399_v1 = vmov (!%p241_p9), 1983009808   ;;  %v3400_v3 = vmov (!%p241_p9), 0.0   ;;  %vm3401_vm0 = vmmov (!%p241_p9), 0   ;;  %s3403_s18 = smov (!%p241_p9), 127  }
   0xe   : > { %244 = sbr.rel (%p241_p9) target bundleno = 1788 (0x6fc), region = 48  ;;  %v347_v2 = vunpack.c.l.s4 (!%p241_p9), %v3399_v1  ;;  %3048 = vmatprep.subr.bf16.mxu1 (!%p241_p9), %v3400_v3  ;;  %3050 = vmatprep.mubr.msk.bf16.mxu1 (!%p241_p9), %vm3401_vm0, %v3400_v3  ;;  %v3402_v6 = vmov (!%p241_p9), 0   ;;  %s3404_s19 = smov (!%p241_p9), 126   ;;  %v1528_v48 = vld [vmem:[%s3973_s2] sm:$0xff] (!%p241_p9)  ;;  %v1529_v49 = vld [vmem:[%s3973_s2 + $0x8] sm:$0xff] (!%p241_p9)  ;;  %vm3979_vm1 = vcmask (!%p241_p9), 1041408  }
   0xf   : > { %v350_v4 = vshrl.u32 (!%p241_p9), %v278_v0, 7  ;;  %416 = vmatprep.mubr.bf16.mxu0 (!%p241_p9), %v3402_v6  ;;  %3299 = vset.pattern.permute.xlu0 (!%p241_p9), %v3402_v6  ;;  %s3405_s20 = smov (!%p241_p9), 110   ;;  %s3406_s21 = smov (!%p241_p9), 109   ;;  %vm367_vm2 = vcmask (!%p241_p9), 1039360   ;;  %v3309_v53 = vld [vmem:[%s3972_s1 + $0x8] sm:$0xff] (!%p241_p9)   ;;  %vm370_vm3 = vcmask (!%p241_p9), 31744  }
  0x10   : > { %v348_v5 = vunpack.c.0.s8 (!%p241_p9), %v347_v2  ;;  %3300 = vset.pattern.permute.xlu1 (!%p241_p9), %v3402_v6  ;;  %s3407_s22 = smov (!%p241_p9), 108   ;;  %s3408_s23 = smov (!%p241_p9), 92   ;;  %vm601_vm4 = vcmask (!%p241_p9), 1031168   ;;  %v3310_v63 = vld [vmem:[%s3972_s1] sm:$0xff] (!%p241_p9)   ;;  %vm738_vm5 = vcmask (!%p241_p9), 900096   ;;  %vm875_vm6 = vcmask (!%p241_p9), 891904  }
  0x11   : > { %s3409_s29 = smov (!%p241_p9), 91   ;;  %s3410_s8 = smov (!%p241_p9), 90   ;;  %vm1012_vm7 = vcmask (!%p241_p9), 883712   ;;  %vm1149_vm8 = vcmask (!%p241_p9), 752640   ;;  %vm3981_vm9 = vcmask (!%p241_p9), 744448   ;;  %vm3980_vm10 = vcmask (!%p241_p9), 736256  }
  0x12   : > { %v3512_v7 = vsub.s32 (!%p241_p9), %v348_v5, %v350_v4  ;;  %vm1564_vm11 = vcmask (!%p241_p9), 154624   ;;  %s3411_s16 = smov (!%p241_p9), 19   ;;  %s3413_s9 = smov (!%p241_p9), [#allocation3]  }
  0x13   : > { %1565 = vst.msk [vmem:[#allocation2] sm:$0xff] (!%p241_p9), %vm1564_vm11, %v3402_v6 }
  0x15   : > { %s273_s13 = scalar_select %p272_p10, %s3477_s28, 1 }
  0x17   : > { %s3236_s14 = smul.u32 6, %s273_s13  ;;  %s3339_s13 = sshll.u32 %s3413_s9, 4  ;;  %s3340_s13 = int_to_ptr.vmem [resolvable:$false] %s3339_s13 }
  0x19   : > { %s3518_s17 = scalar_lea.vmem %s3971_s0, %s3236_s14  ;;  %s3341_s14 = scalar_lea.vmem %s3340_s13, 1536 }
  0x1a   : > { %v333_v8 = vld [vmem:[%s3518_s17] sm:$0x3f] }
  0x1b   : > { %v3522_v9 = vrot.slane %v333_v8, %v3512_v7  ;;  %v345_v10 = vcombine.high %v333_v8, %v333_v8  ;;  %v569_v11 = vld [vmem:[%s3518_s17] sm:$0x3f] }
  0x1c   : > { %v586_v14 = vrot.slane %v569_v11, %v3512_v7  ;;  %v579_v15 = vcombine.high %v569_v11, %v569_v11  ;;  %v706_v16 = vld [vmem:[%s3518_s17] sm:$0x3f] }
  0x1d   : > { %361 = vrot.lane.b32.xlu0 %v3522_v9, %s3403_s18  ;;  %v3528_v12 = vrot.slane %v345_v10, %v3512_v7  ;;  %v3532_v13 = vcombine.high %v3522_v9, %v3522_v9  ;;  %v723_v19 = vrot.slane %v706_v16, %v3512_v7  ;;  %v716_v20 = vcombine.high %v706_v16, %v706_v16  ;;  %v843_v22 = vld [vmem:[%s3518_s17] sm:$0x3f]  ;;  %v3312_v16 = vld [vmem:[%s3972_s1 + $0x18] sm:$0xff]  }
  0x1e   : > { %v594_v17 = vcombine.high %v586_v14, %v586_v14  ;;  %v593_v18 = vrot.slane %v579_v15, %v3512_v7  ;;  %v860_v24 = vrot.slane %v843_v22, %v3512_v7  ;;  %v853_v25 = vcombine.high %v843_v22, %v843_v22  ;;  %v980_v27 = vld [vmem:[%s3518_s17] sm:$0x3f] }
  0x1f   : > { %365 = vrot.lane.b32.xlu1 %v3528_v12, %s3403_s18  ;;  %v731_v21 = vcombine.high %v723_v19, %v723_v19  ;;  %v730_v23 = vrot.slane %v716_v20, %v3512_v7  ;;  %v997_v29 = vrot.slane %v980_v27, %v3512_v7  ;;  %v990_v30 = vcombine.high %v980_v27, %v980_v27  ;;  %v1117_v32 = vld [vmem:[%s3518_s17] sm:$0x3f] }
  0x20   : > { %v868_v26 = vcombine.high %v860_v24, %v860_v24  ;;  %v867_v28 = vrot.slane %v853_v25, %v3512_v7  ;;  %v1134_v34 = vrot.slane %v1117_v32, %v3512_v7  ;;  %v1127_v35 = vcombine.high %v1117_v32, %v1117_v32  ;;  %v1254_v37 = vld [vmem:[%s3518_s17] sm:$0x3f] }
  0x21   : > { %363 = vrot.lane.b32.xlu0 %v3532_v13, %s3403_s18  ;;  %v1005_v31 = vcombine.high %v997_v29, %v997_v29  ;;  %v1004_v33 = vrot.slane %v990_v30, %v3512_v7  ;;  %v1271_v39 = vrot.slane %v1254_v37, %v3512_v7  ;;  %v1264_v40 = vcombine.high %v1254_v37, %v1254_v37  ;;  %v1391_v42 = vld [vmem:[%s3518_s17] sm:$0x3f]  ;;  %v3314_v30 = vld [vmem:[%s3972_s1 + $0x28] sm:$0xff]   ;;  %v3315_v37 = vld [vmem:[%s3972_s1 + $0x30] sm:$0xff]  }
  0x22   : > { %v1142_v36 = vcombine.high %v1134_v34, %v1134_v34  ;;  %v1141_v38 = vrot.slane %v1127_v35, %v3512_v7  ;;  %v1408_v44 = vrot.slane %v1391_v42, %v3512_v7  ;;  %v1401_v45 = vcombine.high %v1391_v42, %v1391_v42 }
  0x23   : > { %595 = vrot.lane.b32.xlu1 %v586_v14, %s3404_s19  ;;  %v1279_v41 = vcombine.high %v1271_v39, %v1271_v39  ;;  %v1278_v43 = vrot.slane %v1264_v40, %v3512_v7  ;;  %v483_v57 = vsel %vm3979_vm1, %v3528_v12, 0  ;;  %v477_v60 = vsel %vm3979_vm1, %v3522_v9, 0  ;;  %v3311_v9 = vld [vmem:[%s3972_s1 + $0x10] sm:$0xff]  }
  0x24   : > { %v1416_v46 = vcombine.high %v1408_v44, %v1408_v44  ;;  %v1415_v47 = vrot.slane %v1401_v45, %v3512_v7 }
  0x25   : > { %597 = vrot.lane.b32.xlu0 %v594_v17, %s3404_s19 }
  0x27   : > { %599 = vrot.lane.b32.xlu1 %v593_v18, %s3404_s19 }
  0x29   : > { %732 = vrot.lane.b32.xlu0 %v723_v19, %s3405_s20 }
  0x2b   : > { %734 = vrot.lane.b32.xlu1 %v731_v21, %s3405_s20 }
  0x2d   : > { %736 = vrot.lane.b32.xlu0 %v730_v23, %s3405_s20 }
  0x2f   : > { %869 = vrot.lane.b32.xlu1 %v860_v24, %s3406_s21  ;;  %v3313_v24 = vld [vmem:[%s3972_s1 + $0x20] sm:$0xff]  }
  0x31   : > { %871 = vrot.lane.b32.xlu0 %v868_v26, %s3406_s21 }
  0x33   : > { %873 = vrot.lane.b32.xlu1 %v867_v28, %s3406_s21 }
  0x35   : > { %1006 = vrot.lane.b32.xlu0 %v997_v29, %s3407_s22 }
  0x37   : > { %1008 = vrot.lane.b32.xlu1 %v1005_v31, %s3407_s22 }
  0x39   : > { %1010 = vrot.lane.b32.xlu0 %v1004_v33, %s3407_s22 }
  0x3b   : > { %1143 = vrot.lane.b32.xlu1 %v1134_v34, %s3408_s23 }
  0x3d   : > { %1145 = vrot.lane.b32.xlu0 %v1142_v36, %s3408_s23 }
  0x3f   : > { %1147 = vrot.lane.b32.xlu1 %v1141_v38, %s3408_s23 }
  0x41   : > { %1280 = vrot.lane.b32.xlu0 %v1271_v39, %s3409_s29 }
  0x43   : > { %1282 = vrot.lane.b32.xlu1 %v1279_v41, %s3409_s29 }
  0x45   : > { %1284 = vrot.lane.b32.xlu0 %v1278_v43, %s3409_s29 }
  0x47   : > { %1417 = vrot.lane.b32.xlu1 %v1408_v44, %s3410_s8  ;;  %v3316_v44 = vld [vmem:[%s3972_s1 + $0x38] sm:$0xff]  }
  0x49   : > { %1419 = vrot.lane.b32.xlu0 %v1416_v46, %s3410_s8 }
  0x4b   : > { %1421 = vrot.lane.b32.xlu1 %v1415_v47, %s3410_s8  ;;  %v3317_v47 = vld [vmem:[%s3972_s1 + $0x40] sm:$0xff]  }
  0x4d   : > { %1532 = vperm.xlu0 %3299, %v1528_v48  }
  0x4f   : > { %1537 = vperm.xlu1 %3300, %v1529_v49  }
  0x8f   : > { %v362_v50 = vpop.permute.xlu0 %361 }
  0x91   : > { %v366_v51 = vpop.permute.xlu1 %365 }
  0x92   : > { %v382_v52 = vsel %vm3979_vm1, %v366_v51, 0 }
  0x93   : > { %v364_v54 = vpop.permute.xlu0 %363  ;;  %3049 = vmatpush3.bf16.msra.mxu1 %v382_v52 }
  0x94   : > { %v369_v55 = vsel %vm367_vm2, %v364_v54, %v366_v51  ;;  %v368_v56 = vsel %vm367_vm2, %v362_v50, %v364_v54  ;;  %3054 = vmatprep.subr.bf16.mxu1 %v3400_v3 }
  0x95   : > { %2905 = vmatprep.subr.msk.bf16.mxu0 %vm3979_vm1, %v369_v55  ;;  %v376_v58 = vsel %vm3979_vm1, %v368_v56, 0  ;;  %v596_v59 = vpop.permute.xlu1 %595 }
  0x96   : > { %385 = vmatpush1.bf16.msra.mxu0 %v376_v58  ;;  %3051 = vmatmul.mubr.msk.bf16.vlgmr.msra.gmra.mrb[0].mxu1 %vm370_vm3, %v3309_v53 }
  0x97   : > { %3055 = vmatpush3.bf16.msra.mxu1 %v483_v57  ;;  %3056 = vmatprep.mubr.msk.bf16.mxu1 %vm3401_vm0, %v3400_v3  ;;  %v598_v61 = vpop.permute.xlu0 %597 }
  0x98   : > { %2909 = vmatprep.subr.msk.bf16.mxu0 %vm3979_vm1, %v3532_v13  ;;  %3060 = vmatprep.subr.bf16.mxu1 %v3400_v3  ;;  %v602_v7 = vsel %vm601_vm4, %v596_v59, %v598_v61 }
  0x99   : > { %2906 = vmatmul.mubr.msk.bf16.vlgmr.msra.gmra.mrb[0].mxu0 %vm370_vm3, %v3309_v53  ;;  %v600_v62 = vpop.permute.xlu1 %599  ;;  %v608_v10 = vsel %vm3979_vm1, %v602_v7, 0 }
  0x9a   : > { %486 = vmatpush1.bf16.msra.mxu0 %v477_v60  ;;  %v603_v1 = vsel %vm601_vm4, %v598_v61, %v600_v62  ;;  %517 = vmatprep.mubr.bf16.mxu0 %v3402_v6  ;;  %v614_v4 = vsel %vm3979_vm1, %v600_v62, 0 }
  0x9b   : > { %v733_v2 = vpop.permute.xlu0 %732  ;;  %2915 = vmatprep.subr.msk.bf16.mxu0 %vm3979_vm1, %v603_v1 }
  0x9d   : > { %v735_v5 = vpop.permute.xlu1 %734 }
  0x9e   : > { %3057 = vmatmul.mubr.msk.bf16.vlgmr.msra.gmra.mrb[4].mxu1 %vm370_vm3, %v3310_v63  ;;  %v739_v18 = vsel %vm738_vm5, %v733_v2, %v735_v5 }
  0x9f   : > { %3061 = vmatpush3.bf16.msra.mxu1 %v614_v4  ;;  %3062 = vmatprep.mubr.msk.bf16.mxu1 %vm3401_vm0, %v3400_v3  ;;  %v737_v8 = vpop.permute.xlu0 %736  ;;  %v745_v21 = vsel %vm3979_vm1, %v739_v18, 0 }
  0xa0   : > { %3066 = vmatprep.subr.bf16.mxu1 %v3400_v3  ;;  %v751_v12 = vsel %vm3979_vm1, %v737_v8, 0  ;;  %v740_v14 = vsel %vm738_vm5, %v735_v5, %v737_v8 }
  0xa1   : > { %v870_v11 = vpop.permute.xlu1 %869 }
  0xa3   : > { %v872_v13 = vpop.permute.xlu0 %871 }
  0xa4   : > { %v876_v28 = vsel %vm875_vm6, %v870_v11, %v872_v13 }
  0xa5   : > { %2910 = vmatmul.mubr.msk.bf16.vlgmr.msra.gmra.mrb[0].mxu0 %vm370_vm3, %v3310_v63  ;;  %v874_v15 = vpop.permute.xlu1 %873  ;;  %v882_v31 = vsel %vm3979_vm1, %v876_v28, 0 }
  0xa6   : > { %3063 = vmatmul.mubr.msk.bf16.vlgmr.msra.gmra.mrb[8].mxu1 %vm370_vm3, %v3311_v9  ;;  %617 = vmatpush1.bf16.msra.mxu0 %v608_v10  ;;  %v888_v19 = vsel %vm3979_vm1, %v874_v15, 0  ;;  %v877_v22 = vsel %vm875_vm6, %v872_v13, %v874_v15 }
  0xa7   : > { %3067 = vmatpush3.bf16.msra.mxu1 %v751_v12  ;;  %3068 = vmatprep.mubr.msk.bf16.mxu1 %vm3401_vm0, %v3400_v3  ;;  %v1007_v17 = vpop.permute.xlu0 %1006 }
  0xa8   : > { %648 = vmatprep.mubr.bf16.mxu0 %v3402_v6  ;;  %3072 = vmatprep.subr.bf16.mxu1 %v3400_v3 }
  0xa9   : > { %2921 = vmatprep.subr.msk.bf16.mxu0 %vm3979_vm1, %v740_v14  ;;  %v1009_v20 = vpop.permute.xlu1 %1008 }
  0xaa   : > { %v1013_v39 = vsel %vm1012_vm7, %v1007_v17, %v1009_v20 }
  0xab   : > { %v1011_v23 = vpop.permute.xlu0 %1010  ;;  %v1019_v41 = vsel %vm3979_vm1, %v1013_v39, 0 }
  0xac   : > { %v1025_v26 = vsel %vm3979_vm1, %v1011_v23, 0  ;;  %v1014_v35 = vsel %vm1012_vm7, %v1009_v20, %v1011_v23  ;;  %v279_v20 = vand.u32 127, %v278_v0 }
  0xad   : > { %v1144_v25 = vpop.permute.xlu1 %1143 }
  0xae   : > { %3069 = vmatmul.mubr.msk.bf16.vlgmr.msra.gmra.mrb[12].mxu1 %vm370_vm3, %v3312_v16 }
  0xaf   : > { %3073 = vmatpush3.bf16.msra.mxu1 %v888_v19  ;;  %3074 = vmatprep.mubr.msk.bf16.mxu1 %vm3401_vm0, %v3400_v3  ;;  %v1146_v27 = vpop.permute.xlu0 %1145 }
  0xb0   : > { %3078 = vmatprep.subr.bf16.mxu1 %v3400_v3  ;;  %v1150_v46 = vsel %vm1149_vm8, %v1144_v25, %v1146_v27 }
  0xb1   : > { %2916 = vmatmul.mubr.msk.bf16.vlgmr.msra.gmra.mrb[0].mxu0 %vm370_vm3, %v3311_v9  ;;  %v1148_v29 = vpop.permute.xlu1 %1147  ;;  %v1156_v48 = vsel %vm3979_vm1, %v1150_v46, 0 }
  0xb2   : > { %754 = vmatpush1.bf16.msra.mxu0 %v745_v21  ;;  %785 = vmatprep.mubr.bf16.mxu0 %v3402_v6  ;;  %v1162_v33 = vsel %vm3979_vm1, %v1148_v29, 0  ;;  %v1151_v42 = vsel %vm1149_vm8, %v1146_v27, %v1148_v29 }
  0xb3   : > { %2927 = vmatprep.subr.msk.bf16.mxu0 %vm3979_vm1, %v877_v22  ;;  %v1281_v32 = vpop.permute.xlu0 %1280 }
  0xb5   : > { %v1283_v34 = vpop.permute.xlu1 %1282 }
  0xb6   : > { %3075 = vmatmul.mubr.msk.bf16.vlgmr.msra.gmra.mrb[16].mxu1 %vm370_vm3, %v3313_v24  ;;  %v1287_v50 = vsel %vm3981_vm9, %v1281_v32, %v1283_v34 }
  0xb7   : > { %3079 = vmatpush3.bf16.msra.mxu1 %v1025_v26  ;;  %3080 = vmatprep.mubr.msk.bf16.mxu1 %vm3401_vm0, %v3400_v3  ;;  %v1285_v36 = vpop.permute.xlu0 %1284  ;;  %v1293_v52 = vsel %vm3979_vm1, %v1287_v50, 0 }
  0xb8   : > { %3084 = vmatprep.subr.bf16.mxu1 %v3400_v3  ;;  %v1299_v40 = vsel %vm3979_vm1, %v1285_v36, 0  ;;  %v1288_v49 = vsel %vm3981_vm9, %v1283_v34, %v1285_v36  ;;  %vm1566_vm9 = vcmask 1047960  }
  0xb9   : > { %v1418_v38 = vpop.permute.xlu1 %1417  ;;  %1567 = vst.msk [vmem:[#allocation2 + $0x10] sm:$0xff] %vm1566_vm9, %v3402_v6  ;;  %vm1589_vm9 = vcmask 416768  }
  0xbb   : > { %v1420_v51 = vpop.permute.xlu0 %1419 }
  0xbc   : > { %v1424_v54 = vsel %vm3980_vm10, %v1418_v38, %v1420_v51 }
  0xbd   : > { %2922 = vmatmul.mubr.msk.bf16.vlgmr.msra.gmra.mrb[0].mxu0 %vm370_vm3, %v3312_v16  ;;  %v1422_v43 = vpop.permute.xlu1 %1421  ;;  %v1430_v55 = vsel %vm3979_vm1, %v1424_v54, 0 }
  0xbe   : > { %3081 = vmatmul.mubr.msk.bf16.vlgmr.msra.gmra.mrb[20].mxu1 %vm370_vm3, %v3314_v30  ;;  %891 = vmatpush1.bf16.msra.mxu0 %v882_v31  ;;  %v1436_v45 = vsel %vm3979_vm1, %v1422_v43, 0  ;;  %v1425_v53 = vsel %vm3980_vm10, %v1420_v51, %v1422_v43 }
  0xbf   : > { %3085 = vmatpush3.bf16.msra.mxu1 %v1162_v33  ;;  %3086 = vmatprep.mubr.msk.bf16.mxu1 %vm3401_vm0, %v3400_v3 }
  0xc0   : > { %922 = vmatprep.mubr.bf16.mxu0 %v3402_v6  ;;  %3090 = vmatprep.subr.bf16.mxu1 %v3400_v3 }
  0xc1   : > { %2933 = vmatprep.subr.msk.bf16.mxu0 %vm3979_vm1, %v1014_v35 }
  0xc6   : > { %3087 = vmatmul.mubr.msk.bf16.vlgmr.msra.gmra.mrb[24].mxu1 %vm370_vm3, %v3315_v37 }
  0xc7   : > { %3091 = vmatpush3.bf16.msra.mxu1 %v1299_v40  ;;  %3092 = vmatprep.mubr.msk.bf16.mxu1 %vm3401_vm0, %v3400_v3 }
  0xc8   : > { %3096 = vmatprep.subr.bf16.mxu1 %v3400_v3 }
  0xc9   : > { %2928 = vmatmul.mubr.msk.bf16.vlgmr.msra.gmra.mrb[0].mxu0 %vm370_vm3, %v3313_v24  ;;  %v281_v24 = vadd.s32 256, %v279_v20 }
  0xca   : > { %1028 = vmatpush1.bf16.msra.mxu0 %v1019_v41  ;;  %1059 = vmatprep.mubr.bf16.mxu0 %v3402_v6 }
  0xcb   : > { %2939 = vmatprep.subr.msk.bf16.mxu0 %vm3979_vm1, %v1151_v42  ;;  %v3715_v28 = vmul.u32.u64.low 3817748708, %v281_v24  ;;  %v3716_v29 = vmul.u32.u64.high 3817748708, %v281_v24, %v3715_v28 }
  0xcc   : > { %v3412_v28 = vmov 0.0|0.0  }
  0xcd   : > { %v310_v36 = vshrl.u32 %v3716_v29, 4 }
  0xce   : > { %3093 = vmatmul.mubr.msk.bf16.vlgmr.msra.gmra.mrb[28].mxu1 %vm370_vm3, %v3316_v44 }
  0xcf   : > { %3097 = vmatpush3.bf16.msra.mxu1 %v1436_v45  ;;  %3098 = vmatprep.mubr.msk.bf16.mxu1 %vm3401_vm0, %v3400_v3  ;;  %v311_v39 = vmul.u32 18, %v310_v36 }
  0xd0   : > { %3102 = vmatprep.subr.bf16.mxu1 %v3400_v3 }
  0xd1   : > { %v312_v43 = vsub.s32 %v281_v24, %v311_v39 }
  0xd3   : > { %vm317_vm12 = vcmp.ne.s32.totalorder %v312_v43, 0  ;;  %vm320_vm13 = vcmp.lt.s32.totalorder %v312_v43, 0 }
  0xd4   : > { %vm323_vm14 = vmand %vm320_vm13, %vm317_vm12 }
  0xd5   : > { %2934 = vmatmul.mubr.msk.bf16.vlgmr.msra.gmra.mrb[0].mxu0 %vm370_vm3, %v3314_v30 }
  0xd6   : > { %3099 = vmatmul.mubr.msk.bf16.vlgmr.msra.gmra.mrb[32].mxu1 %vm370_vm3, %v3317_v47  ;;  %1165 = vmatpush1.bf16.msra.mxu0 %v1156_v48 }
  0xd7   : > { %1196 = vmatprep.mubr.bf16.mxu0 %v3402_v6  ;;  %2945 = vmatprep.subr.msk.bf16.mxu0 %vm3979_vm1, %v1288_v49  ;;  %v1533_v49 = vpop.permute.xlu0 %1532 }
  0xd8   : > { %3104 = vmatprep.mubr.msk.bf16.mxu1 %vm3401_vm0, %v3400_v3 }
  0xe1   : > { %2940 = vmatmul.mubr.msk.bf16.vlgmr.msra.gmra.mrb[0].mxu0 %vm370_vm3, %v3315_v37 }
  0xe2   : > { %1302 = vmatpush1.bf16.msra.mxu0 %v1293_v52  ;;  %1333 = vmatprep.mubr.bf16.mxu0 %v3402_v6 }
  0xe3   : > { %2951 = vmatprep.subr.msk.bf16.mxu0 %vm3979_vm1, %v1425_v53  ;;  %v1538_v53 = vpop.permute.xlu1 %1537 }
  0xed   : > { %2946 = vmatmul.mubr.msk.bf16.vlgmr.msra.gmra.mrb[0].mxu0 %vm370_vm3, %v3316_v44 }
  0xee   : > { %1439 = vmatpush1.bf16.msra.mxu0 %v1430_v55  ;;  %1470 = vmatprep.mubr.bf16.mxu0 %v3402_v6 }
  0xf9   : > { %2952 = vmatmul.mubr.msk.bf16.vlgmr.msra.gmra.mrb[0].mxu0 %vm370_vm3, %v3317_v47  ;;  %v326_v47 = vadd.s32 18, %v312_v43 }
  0xfa   : > { %1654 = vmatprep.mubr.bf16.mxu0 %v3402_v6 }
 0x169   : > { %v461_v56 = vpop.f32.mrb[0].mxu1 }
 0x16a   : > { %v3052_v57 = vpop.f32.mrb[1].mxu1 }
 0x16b   : > { %v464_v58 = vpop.f32.mrb[2].mxu1  ;;  %v329_v57 = vsel %vm323_vm14, %v326_v47, %v312_v43  ;;  %v2583_v47 = vld [vmem:[%s3975_s4 + $0x8] sm:$0xff] }
 0x16c   : > { %v3053_v59 = vpop.f32.mrb[3].mxu1  ;;  %vm3719_vm15 = vcmp.lt.s32.totalorder %v329_v57, 16  ;;  %v3319_v57 = vld [vmem:[%s3974_s3] sm:$0xff]  }
 0x171   : > { %v562_v60 = vpop.f32.mrb[4].mxu1 }
 0x172   : > { %v563_v61 = vadd.f32 %v562_v60, %v461_v56  ;;  %v3058_v62 = vpop.f32.mrb[5].mxu1 }
 0x173   : > { %v565_v63 = vpop.f32.mrb[6].mxu1  ;;  %v280_v62 = vadd.s32 128, %v279_v20 }
 0x174   : > { %v566_v1 = vadd.f32 %v565_v63, %v464_v58  ;;  %v3059_v2 = vpop.f32.mrb[7].mxu1 }
 0x179   : > { %v693_v4 = vpop.f32.mrb[8].mxu1 }
 0x17a   : > { %v702_v5 = vadd.f32 %v693_v4, %v563_v61  ;;  %v3064_v7 = vpop.f32.mrb[9].mxu1  ;;  %v3727_v2 = vmul.u32.u64.low 3817748708, %v279_v20  ;;  %v3728_v4 = vmul.u32.u64.high 3817748708, %v279_v20, %v3727_v2 }
 0x17b   : > { %v696_v8 = vpop.f32.mrb[10].mxu1 }
 0x17c   : > { %v705_v9 = vadd.f32 %v696_v8, %v566_v1  ;;  %v3065_v10 = vpop.f32.mrb[11].mxu1  ;;  %v3730_v7 = vmul.u32.u64.low 3817748708, %v280_v62  ;;  %v3731_v8 = vmul.u32.u64.high 3817748708, %v280_v62, %v3730_v7 }
 0x17d   : > { %v3321_v7 = vld [vmem:[%s3974_s3 + $0x18] sm:$0xff]  }
 0x17e   : > { %v299_v10 = vshrl.u32 %v3731_v8, 4 }
 0x181   : > { %v830_v11 = vpop.f32.mrb[12].mxu1 }
 0x182   : > { %v839_v12 = vadd.f32 %v830_v11, %v702_v5  ;;  %v3070_v13 = vpop.f32.mrb[13].mxu1 }
 0x183   : > { %v833_v14 = vpop.f32.mrb[14].mxu1 }
 0x184   : > { %v842_v15 = vadd.f32 %v833_v14, %v705_v9  ;;  %v3071_v16 = vpop.f32.mrb[15].mxu1  ;;  %v288_v9 = vshrl.u32 %v3728_v4, 4 }
 0x186   : > { %v289_v11 = vmul.u32 18, %v288_v9 }
 0x188   : > { %v290_v13 = vsub.s32 %v279_v20, %v289_v11 }
 0x189   : > { %v967_v17 = vpop.f32.mrb[16].mxu1 }
 0x18a   : > { %v976_v18 = vadd.f32 %v967_v17, %v839_v12  ;;  %v3076_v19 = vpop.f32.mrb[17].mxu1  ;;  %v300_v12 = vmul.u32 18, %v299_v10  ;;  %vm315_vm3 = vcmp.ne.s32.totalorder %v290_v13, 0  ;;  %vm318_vm12 = vcmp.lt.s32.totalorder %v290_v13, 0 }
 0x18b   : > { %v970_v21 = vpop.f32.mrb[18].mxu1  ;;  %vm321_vm1 = vmand %vm318_vm12, %vm315_vm3 }
 0x18c   : > { %v979_v22 = vadd.f32 %v970_v21, %v842_v15  ;;  %v3077_v23 = vpop.f32.mrb[19].mxu1  ;;  %v301_v14 = vsub.s32 %v280_v62, %v300_v12  ;;  %v324_v15 = vadd.s32 18, %v290_v13  ;;  %v3320_v62 = vld [vmem:[%s3974_s3 + $0x10] sm:$0xff]   ;;  %v3322_v12 = vld [vmem:[%s3974_s3 + $0x20] sm:$0xff]  }
 0x18e   : > { %vm316_vm13 = vcmp.ne.s32.totalorder %v301_v14, 0  ;;  %vm319_vm14 = vcmp.lt.s32.totalorder %v301_v14, 0  ;;  %v325_v16 = vadd.s32 18, %v301_v14  ;;  %v327_v19 = vsel %vm321_vm1, %v324_v15, %v290_v13 }
 0x18f   : > { %vm3735_vm10 = vmand %vm319_vm14, %vm316_vm13  ;;  %vm3742_vm3 = vcmp.lt.s32.totalorder %v327_v19, 16  ;;  %vm1586_vm1 = vcmask 1047704  }
 0x190   : > { %v328_v20 = vsel %vm3735_vm10, %v325_v16, %v301_v14  ;;  %vm1618_vm10 = vcmask 130048   ;;  %v3323_v16 = vld [vmem:[%s3974_s3 + $0x28] sm:$0xff]  }
 0x191   : > { %v1104_v25 = vpop.f32.mrb[20].mxu1  ;;  %vm3746_vm12 = vcmp.lt.s32.totalorder %v328_v20, 16  ;;  %v3324_v20 = vld [vmem:[%s3974_s3 + $0x30] sm:$0xff]  }
 0x192   : > { %v1113_v26 = vadd.f32 %v1104_v25, %v976_v18  ;;  %v3082_v27 = vpop.f32.mrb[21].mxu1 }
 0x193   : > { %v1107_v30 = vpop.f32.mrb[22].mxu1 }
 0x194   : > { %v1116_v31 = vadd.f32 %v1107_v30, %v979_v22  ;;  %v3083_v32 = vpop.f32.mrb[23].mxu1 }
 0x199   : > { %v1241_v33 = vpop.f32.mrb[24].mxu1 }
 0x19a   : > { %v1250_v34 = vadd.f32 %v1241_v33, %v1113_v26  ;;  %v3088_v35 = vpop.f32.mrb[25].mxu1 }
 0x19b   : > { %v1244_v37 = vpop.f32.mrb[26].mxu1 }
 0x19c   : > { %v1253_v0 = vadd.f32 %v1244_v37, %v1116_v31  ;;  %v3089_v38 = vpop.f32.mrb[27].mxu1  ;;  %v2625_v31 = vld [vmem:[%s3976_s5] sm:$0x3] }
 0x1a1   : > { %v1378_v40 = vpop.f32.mrb[28].mxu1 }
 0x1a2   : > { %v1387_v41 = vadd.f32 %v1378_v40, %v1250_v34  ;;  %v3094_v42 = vpop.f32.mrb[29].mxu1 }
 0x1a3   : > { %v1381_v44 = vpop.f32.mrb[30].mxu1 }
 0x1a4   : > { %v1390_v45 = vadd.f32 %v1381_v44, %v1253_v0  ;;  %v3095_v46 = vpop.f32.mrb[31].mxu1 }
 0x1a5   : > { %v2582_v46 = vld [vmem:[%s3975_s4] sm:$0xff] }
 0x1a9   : > { %v1515_v48 = vpop.f32.mrb[32].mxu1 }
 0x1aa   : > { %v1524_v50 = vadd.f32 %v1515_v48, %v1387_v41  ;;  %v3100_v51 = vpop.f32.mrb[33].mxu1 }
 0x1ab   : > { %v1518_v52 = vpop.f32.mrb[34].mxu1  ;;  %v3318_v51 = vld [vmem:[%s3974_s3 + $0x8] sm:$0xff]  }
 0x1ac   : > { %v1542_v54 = vadd.f32 %v1533_v49, %v1524_v50  ;;  %v1527_v55 = vadd.f32 %v1518_v52, %v1390_v45  ;;  %v3101_v56 = vpop.f32.mrb[35].mxu1 }
 0x1ae   : > { %v1548_v58 = vmax.f32 %v1542_v54, 0.0  ;;  %v1545_v59 = vadd.f32 %v1538_v53, %v1527_v55 }
 0x1b0   : > { %v1551_v61 = vmax.f32 %v1545_v59, 0.0  ;;  %v1560_v63 = vsel %vm3719_vm15, %v1548_v58, 0.0 }
 0x1b2   : > { %v1563_v1 = vsel %vm3719_vm15, %v1551_v61, 0.0 }
 0x1b3   : > { %v1570_v5 = vpack.c.bf16 %v1563_v1, %v1560_v63 }
 0x1cc   : > { %v1472_v18 = vpop.f32.mrb[0].mxu0 }
 0x1cd   : > { %v1540_v21 = vadd.f32 %v1533_v49, %v1472_v18  ;;  %v1474_v22 = vpop.f32.mrb[1].mxu0 }
 0x1ce   : > { %v1541_v23 = vadd.f32 %v1533_v49, %v1474_v22  ;;  %v1476_v24 = vpop.f32.mrb[2].mxu0 }
 0x1cf   : > { %v1546_v25 = vmax.f32 %v1540_v21, 0.0  ;;  %v1543_v26 = vadd.f32 %v1538_v53, %v1476_v24  ;;  %v1478_v27 = vpop.f32.mrb[3].mxu0 }
 0x1d0   : > { %v1547_v29 = vmax.f32 %v1541_v23, 0.0  ;;  %v1544_v30 = vadd.f32 %v1538_v53, %v1478_v27  ;;  %v3325_v27 = vld [vmem:[%s3974_s3 + $0x38] sm:$0xff]  }
 0x1d1   : > { %v1549_v32 = vmax.f32 %v1543_v26, 0.0  ;;  %v1558_v34 = vsel %vm3742_vm3, %v1546_v25, 0.0 }
 0x1d2   : > { %v1550_v33 = vmax.f32 %v1544_v30, 0.0  ;;  %v1559_v36 = vsel %vm3746_vm12, %v1547_v29, 0.0  ;;  %v3326_v30 = vld [vmem:[%s3974_s3 + $0x40] sm:$0xff]  }
 0x1d3   : > { %v1561_v35 = vsel %vm3742_vm3, %v1549_v32, 0.0 }
 0x1d4   : > { %v1562_v37 = vsel %vm3746_vm12, %v1550_v33, 0.0  ;;  %v1568_v0 = vpack.c.bf16 %v1561_v35, %v1558_v34 }
 0x1d5   : > { %v1569_v38 = vpack.c.bf16 %v1562_v37, %v1559_v36 }
 0x1d6   : > { %1574 = vrot.lane.b32.xlu1 %v1568_v0, %s3411_s16 }
 0x1d7   : > { %1576 = vrot.lane.b32.xlu0 %v1569_v38, %s3411_s16 }
 0x1da   : > { %1578 = vrot.lane.b32.xlu1 %v1570_v5, %s3411_s16 }
 0x248   : > { %v1575_v39 = vpop.permute.xlu1 %1574 }
 0x249   : > { %1587 = vst.msk [vmem:[#allocation2] sm:$0xff] %vm1586_vm1, %v1575_v39  ;;  %v1577_v40 = vpop.permute.xlu0 %1576 }
 0x24a   : > { %v1581_v41 = vsel %vm1564_vm11, %v1575_v39, %v1577_v40 }
 0x24b   : > { %1609 = vrot.lane.b32.xlu0 %v1581_v41, %s3403_s18 }
 0x24c   : > { %v1579_v42 = vpop.permute.xlu1 %1578 }
 0x24d   : > { %v1582_v43 = vsel %vm1564_vm11, %v1577_v40, %v1579_v42 }
 0x24e   : > { %1590 = vst.msk [vmem:[#allocation2 + $0x10] sm:$0xff] %vm1589_vm9, %v1582_v43 }
 0x250   : > { %v1591_v44 = vld [vmem:[#allocation2] sm:$0xff] }
 0x251   : > { %1607 = vrot.lane.b32.xlu0 %v1591_v44, %s3403_s18 }
 0x255   : > { %v1593_v45 = vld [vmem:[#allocation2 + $0x10] sm:$0xff] }
 0x256   : > { %1611 = vrot.lane.b32.xlu1 %v1593_v45, %s3403_s18  ;;  %1810 = vrot.lane.b32.xlu0 %v1593_v45, %s3404_s19  ;;  %s269_s18 = sand.u32 1, %s3389_s25  }
 0x25a   : > { %1808 = vrot.lane.b32.xlu1 %v1581_v41, %s3404_s19  ;;  %1920 = vrot.lane.b32.xlu0 %v1581_v41, %s3405_s20 }
 0x25e   : > { %1806 = vrot.lane.b32.xlu1 %v1591_v44, %s3404_s19  ;;  %1918 = vrot.lane.b32.xlu0 %v1591_v44, %s3405_s20  ;;  %s3235_s19 = smul.u32 48, %s269_s18 }
 0x262   : > { %1922 = vrot.lane.b32.xlu1 %v1593_v45, %s3405_s20  ;;  %2034 = vrot.lane.b32.xlu0 %v1593_v45, %s3406_s21  ;;  %s271_s20 = scalar_lea.vmem [#allocation3], %s3235_s19 }
 0x266   : > { %2032 = vrot.lane.b32.xlu1 %v1581_v41, %s3406_s21  ;;  %2144 = vrot.lane.b32.xlu0 %v1581_v41, %s3407_s22 }
 0x26a   : > { %2030 = vrot.lane.b32.xlu1 %v1591_v44, %s3406_s21  ;;  %2142 = vrot.lane.b32.xlu0 %v1591_v44, %s3407_s22  ;;  %s2835_s21 = sshll.u32 %s271_s20, 4  ;;  %s3919_s21 = int_to_ptr.vmem [resolvable:$true] %s2835_s21 }
 0x26b   : > { %s3335_s17 = scalar_lea.vmem %s3919_s21, 768  ;;  %p3342_p0 = scmp.lt.s32.totalorder %s3919_s21, %s3340_s13 }
 0x26c   : > { %p3336_p11 = scmp.ne.s32.totalorder %s3919_s21, %s3335_s17  ;;  %p3343_p1 = scmp.lt.s32.totalorder %s3341_s14, %s3335_s17 }
 0x26e   : > { %2146 = vrot.lane.b32.xlu1 %v1593_v45, %s3407_s22  ;;  %2258 = vrot.lane.b32.xlu0 %v1593_v45, %s3408_s23  ;;  %s3243_s22 = smul.u32 768, %s3477_s28  ;;  %s3930_s28 = scalar_lea.sflag [#allocation4], %s269_s18 }
 0x26f   : > { %p3337_p12 = pnand %p3336_p11, %p3494_p5  ;;  %p3344_p2 = por %p3343_p1, %p3342_p0 }
 0x271   : > { %p3338_p13 = pneg %p3337_p12 }
 0x272   : > { %2256 = vrot.lane.b32.xlu1 %v1581_v41, %s3408_s23  ;;  %2368 = vrot.lane.b32.xlu0 %v1581_v41, %s3409_s29 }
 0x273   : > { %p3345_p3 = pnand %p3344_p2, %p3338_p13 }
 0x276   : > { %2254 = vrot.lane.b32.xlu1 %v1591_v44, %s3408_s23  ;;  %2366 = vrot.lane.b32.xlu0 %v1591_v44, %s3409_s29 }
 0x27a   : > { %2370 = vrot.lane.b32.xlu1 %v1593_v45, %s3409_s29  ;;  %2482 = vrot.lane.b32.xlu0 %v1593_v45, %s3410_s8 }
 0x27e   : > { %2480 = vrot.lane.b32.xlu1 %v1581_v41, %s3410_s8  ;;  %2586 = vperm.xlu0 %3299, %v2582_v46  }
 0x282   : > { %2478 = vrot.lane.b32.xlu1 %v1591_v44, %s3410_s8  ;;  %s3926_s8 = scalar_lea.hbm %s3978_s7, %s3243_s22 }
 0x286   : > { %2591 = vperm.xlu1 %3300, %v2583_v47  }
 0x2bd   : > { %v1610_v48 = vpop.permute.xlu0 %1609 }
 0x2c3   : > { %v1608_v49 = vpop.permute.xlu0 %1607 }
 0x2c4   : > { %v1613_v53 = vsel %vm367_vm2, %v1608_v49, %v1610_v48 }
 0x2c8   : > { %v1612_v50 = vpop.permute.xlu1 %1611  ;;  %v1811_v55 = vpop.permute.xlu0 %1810 }
 0x2c9   : > { %3103 = vmatpush3.bf16.msra.mxu1 %v1612_v50  ;;  %v1614_v52 = vsel %vm367_vm2, %v1610_v48, %v1612_v50  ;;  %vm3992_vm2 = vcmask 744448  }
 0x2ca   : > { %1622 = vmatprep.subr.bf16.mxu0 %v1614_v52  ;;  %3108 = vmatprep.subr.bf16.mxu1 %v3400_v3 }
 0x2cb   : > { %1623 = vmatpush1.bf16.msra.mxu0 %v1613_v53 }
 0x2cc   : > { %3105 = vmatmul.mubr.msk.bf16.vlgmr.msra.gmra.mrb[36].mxu1 %vm1618_vm10, %v3318_v51  ;;  %1714 = vmatprep.subr.bf16.mxu0 %v1581_v41  ;;  %v1809_v54 = vpop.permute.xlu1 %1808  ;;  %v1921_v59 = vpop.permute.xlu0 %1920 }
 0x2cd   : > { %3109 = vmatpush3.bf16.msra.mxu1 %v1593_v45  ;;  %3110 = vmatprep.mubr.msk.bf16.mxu1 %vm3401_vm0, %v3400_v3  ;;  %v1813_v56 = vsel %vm601_vm4, %v1809_v54, %v1811_v55 }
 0x2ce   : > { %2957 = vmatmul.mubr.msk.bf16.vlgmr.msra.gmra.mrb[4].mxu0 %vm1618_vm10, %v3318_v51  ;;  %3114 = vmatprep.subr.bf16.mxu1 %v3400_v3 }
 0x2cf   : > { %1715 = vmatpush1.bf16.msra.mxu0 %v1591_v44  ;;  %1746 = vmatprep.mubr.bf16.mxu0 %v3402_v6 }
 0x2d0   : > { %1820 = vmatprep.subr.bf16.mxu0 %v1813_v56  ;;  %v1807_v58 = vpop.permute.xlu1 %1806  ;;  %v1919_v1 = vpop.permute.xlu0 %1918 }
 0x2d1   : > { %v1812_v63 = vsel %vm601_vm4, %v1807_v58, %v1809_v54  ;;  %v1924_v9 = vsel %vm738_vm5, %v1919_v1, %v1921_v59  ;;  %vm3993_vm4 = vmmov %vm3992_vm2 }
 0x2d4   : > { %3111 = vmatmul.mubr.msk.bf16.vlgmr.msra.gmra.mrb[40].mxu1 %vm1618_vm10, %v3319_v57  ;;  %v1923_v61 = vpop.permute.xlu1 %1922  ;;  %v2035_v5 = vpop.permute.xlu0 %2034 }
 0x2d5   : > { %3115 = vmatpush3.bf16.msra.mxu1 %v1811_v55  ;;  %3116 = vmatprep.mubr.msk.bf16.mxu1 %vm3401_vm0, %v3400_v3  ;;  %v1925_v2 = vsel %vm738_vm5, %v1921_v59, %v1923_v61  ;;  %vm3994_vm5 = vcmask 736256  }
 0x2d6   : > { %3120 = vmatprep.subr.bf16.mxu1 %v3400_v3 }
 0x2d8   : > { %v2033_v4 = vpop.permute.xlu1 %2032  ;;  %v2145_v10 = vpop.permute.xlu0 %2144 }
 0x2d9   : > { %v2037_v11 = vsel %vm875_vm6, %v2033_v4, %v2035_v5 }
 0x2da   : > { %2960 = vmatmul.mubr.msk.bf16.vlgmr.msra.gmra.mrb[4].mxu0 %vm1618_vm10, %v3319_v57 }
 0x2db   : > { %1821 = vmatpush1.bf16.msra.mxu0 %v1812_v63  ;;  %1852 = vmatprep.mubr.bf16.mxu0 %v3402_v6 }
 0x2dc   : > { %1932 = vmatprep.subr.bf16.mxu0 %v1925_v2  ;;  %3117 = vmatmul.mubr.msk.bf16.vlgmr.msra.gmra.mrb[44].mxu1 %vm1618_vm10, %v3320_v62  ;;  %v2031_v8 = vpop.permute.xlu1 %2030  ;;  %v2143_v14 = vpop.permute.xlu0 %2142 }
 0x2dd   : > { %3121 = vmatpush3.bf16.msra.mxu1 %v1923_v61  ;;  %3122 = vmatprep.mubr.msk.bf16.mxu1 %vm3401_vm0, %v3400_v3  ;;  %v2036_v17 = vsel %vm875_vm6, %v2031_v8, %v2033_v4  ;;  %v2148_v24 = vsel %vm1012_vm7, %v2143_v14, %v2145_v10  ;;  %vm3995_vm6 = vmmov %vm3994_vm5 }
 0x2de   : > { %3126 = vmatprep.subr.bf16.mxu1 %v3400_v3 }
 0x2e0   : > { %v2147_v13 = vpop.permute.xlu1 %2146  ;;  %v2259_v18 = vpop.permute.xlu0 %2258 }
 0x2e1   : > { %v2149_v19 = vsel %vm1012_vm7, %v2145_v10, %v2147_v13  ;;  %vm2702_vm7 = vcmask 15360  }
 0x2e4   : > { %3123 = vmatmul.mubr.msk.bf16.vlgmr.msra.gmra.mrb[48].mxu1 %vm1618_vm10, %v3321_v7  ;;  %v2257_v15 = vpop.permute.xlu1 %2256  ;;  %v2369_v22 = vpop.permute.xlu0 %2368 }
 0x2e5   : > { %3127 = vmatpush3.bf16.msra.mxu1 %v2035_v5  ;;  %3128 = vmatprep.mubr.msk.bf16.mxu1 %vm3401_vm0, %v3400_v3  ;;  %v2261_v26 = vsel %vm1149_vm8, %v2257_v15, %v2259_v18 }
 0x2e6   : > { %2965 = vmatmul.mubr.msk.bf16.vlgmr.msra.gmra.mrb[4].mxu0 %vm1618_vm10, %v3320_v62  ;;  %3132 = vmatprep.subr.bf16.mxu1 %v3400_v3 }
 0x2e7   : > { %1933 = vmatpush1.bf16.msra.mxu0 %v1924_v9  ;;  %1964 = vmatprep.mubr.bf16.mxu0 %v3402_v6 }
 0x2e8   : > { %2044 = vmatprep.subr.bf16.mxu0 %v2037_v11  ;;  %v2255_v21 = vpop.permute.xlu1 %2254  ;;  %v2367_v25 = vpop.permute.xlu0 %2366 }
 0x2e9   : > { %v2260_v32 = vsel %vm1149_vm8, %v2255_v21, %v2257_v15  ;;  %v2372_v35 = vsel %vm3993_vm4, %v2367_v25, %v2369_v22  ;;  %vm3996_vm8 = vcmask 1041408  }
 0x2ea   : > { %vm3997_vm11 = vmmov %vm3996_vm8 }
 0x2ec   : > { %3129 = vmatmul.mubr.msk.bf16.vlgmr.msra.gmra.mrb[52].mxu1 %vm1618_vm10, %v3322_v12  ;;  %v2371_v23 = vpop.permute.xlu1 %2370  ;;  %v2483_v29 = vpop.permute.xlu0 %2482 }
 0x2ed   : > { %3133 = vmatpush3.bf16.msra.mxu1 %v2147_v13  ;;  %3134 = vmatprep.mubr.msk.bf16.mxu1 %vm3401_vm0, %v3400_v3  ;;  %v2373_v33 = vsel %vm3992_vm2, %v2369_v22, %v2371_v23 }
 0x2ee   : > { %3138 = vmatprep.subr.bf16.mxu1 %v3400_v3 }
 0x2f0   : > { %v2481_v34 = vpop.permute.xlu1 %2480 }
 0x2f1   : > { %v2485_v36 = vsel %vm3994_vm5, %v2481_v34, %v2483_v29 }
 0x2f2   : > { %2970 = vmatmul.mubr.msk.bf16.vlgmr.msra.gmra.mrb[4].mxu0 %vm1618_vm10, %v3321_v7 }
 0x2f3   : > { %2045 = vmatpush1.bf16.msra.mxu0 %v2036_v17  ;;  %2076 = vmatprep.mubr.bf16.mxu0 %v3402_v6 }
 0x2f4   : > { %2156 = vmatprep.subr.bf16.mxu0 %v2149_v19  ;;  %3135 = vmatmul.mubr.msk.bf16.vlgmr.msra.gmra.mrb[56].mxu1 %vm1618_vm10, %v3323_v16  ;;  %v2479_v37 = vpop.permute.xlu1 %2478 }
 0x2f5   : > { %3139 = vmatpush3.bf16.msra.mxu1 %v2259_v18  ;;  %3140 = vmatprep.mubr.msk.bf16.mxu1 %vm3401_vm0, %v3400_v3  ;;  %v2484_v0 = vsel %vm3995_vm6, %v2479_v37, %v2481_v34 }
 0x2f6   : > { %3144 = vmatprep.subr.bf16.mxu1 %v3400_v3 }
 0x2fc   : > { %3141 = vmatmul.mubr.msk.bf16.vlgmr.msra.gmra.mrb[60].mxu1 %vm1618_vm10, %v3324_v20 }
 0x2fd   : > { %3145 = vmatpush3.bf16.msra.mxu1 %v2371_v23  ;;  %3146 = vmatprep.mubr.msk.bf16.mxu1 %vm3401_vm0, %v3400_v3 }
 0x2fe   : > { %2975 = vmatmul.mubr.msk.bf16.vlgmr.msra.gmra.mrb[4].mxu0 %vm1618_vm10, %v3322_v12  ;;  %3150 = vmatprep.subr.bf16.mxu1 %v3400_v3 }
 0x2ff   : > { %2157 = vmatpush1.bf16.msra.mxu0 %v2148_v24  ;;  %2188 = vmatprep.mubr.bf16.mxu0 %v3402_v6 }
 0x300   : > { %2268 = vmatprep.subr.bf16.mxu0 %v2261_v26 }
 0x304   : > { %3147 = vmatmul.mubr.msk.bf16.vlgmr.msra.gmra.mrb[64].mxu1 %vm1618_vm10, %v3325_v27 }
 0x305   : > { %3151 = vmatpush3.bf16.msra.mxu1 %v2483_v29  ;;  %3152 = vmatprep.mubr.msk.bf16.mxu1 %vm3401_vm0, %v3400_v3  ;;  %v2587_v29 = vpop.permute.xlu0 %2586 }
 0x30a   : > { %2980 = vmatmul.mubr.msk.bf16.vlgmr.msra.gmra.mrb[4].mxu0 %vm1618_vm10, %v3323_v16 }
 0x30b   : > { %2269 = vmatpush1.bf16.msra.mxu0 %v2260_v32  ;;  %2300 = vmatprep.mubr.bf16.mxu0 %v3402_v6  ;;  %v2592_v32 = vpop.permute.xlu1 %2591 }
 0x30c   : > { %2380 = vmatprep.subr.bf16.mxu0 %v2373_v33  ;;  %3153 = vmatmul.mubr.msk.bf16.vlgmr.msra.gmra.mrb[68].mxu1 %vm1618_vm10, %v3326_v30 }
 0x316   : > { %2985 = vmatmul.mubr.msk.bf16.vlgmr.msra.gmra.mrb[4].mxu0 %vm1618_vm10, %v3324_v20 }
 0x317   : > { %2381 = vmatpush1.bf16.msra.mxu0 %v2372_v35  ;;  %2412 = vmatprep.mubr.bf16.mxu0 %v3402_v6 }
 0x318   : > { %2492 = vmatprep.subr.bf16.mxu0 %v2485_v36 }
 0x322   : > { %2990 = vmatmul.mubr.msk.bf16.vlgmr.msra.gmra.mrb[4].mxu0 %vm1618_vm10, %v3325_v27 }
 0x323   : > { %2493 = vmatpush1.bf16.msra.mxu0 %v2484_v0  ;;  %2524 = vmatprep.mubr.bf16.mxu0 %v3402_v6 }
 0x324   : > { %3168 = vmatprep.subr.bf16.mxu0 %v3412_v28 }
 0x32e   : > { %2995 = vmatmul.mubr.msk.bf16.vlgmr.msra.gmra.mrb[4].mxu0 %vm1618_vm10, %v3326_v30 }
 0x32f   : > { %3160 = vmatprep.mubr.msk.f32.mxu0 %vm3401_vm0, %v3400_v3  ;;  %vm2613_vm0 = vcmask 261120  }
 0x39f   : > { %v1699_v38 = vpop.f32.mrb[36].mxu1 }
 0x3a0   : > { %v3106_v39 = vpop.f32.mrb[37].mxu1 }
 0x3a1   : > { %v1702_v40 = vpop.f32.mrb[38].mxu1 }
 0x3a2   : > { %v3107_v41 = vpop.f32.mrb[39].mxu1 }
 0x3a7   : > { %v1791_v42 = vpop.f32.mrb[40].mxu1 }
 0x3a8   : > { %v1792_v43 = vadd.f32 %v1791_v42, %v1699_v38  ;;  %v3112_v44 = vpop.f32.mrb[41].mxu1 }
 0x3a9   : > { %v1794_v45 = vpop.f32.mrb[42].mxu1 }
 0x3aa   : > { %v1795_v46 = vadd.f32 %v1794_v45, %v1702_v40  ;;  %v3113_v47 = vpop.f32.mrb[43].mxu1 }
 0x3af   : > { %v1897_v48 = vpop.f32.mrb[44].mxu1 }
 0x3b0   : > { %v1906_v49 = vadd.f32 %v1897_v48, %v1792_v43  ;;  %v3118_v50 = vpop.f32.mrb[45].mxu1 }
 0x3b1   : > { %v1900_v51 = vpop.f32.mrb[46].mxu1 }
 0x3b2   : > { %v1909_v6 = vadd.f32 %v1900_v51, %v1795_v46  ;;  %v3119_v52 = vpop.f32.mrb[47].mxu1 }
 0x3b7   : > { %v2009_v53 = vpop.f32.mrb[48].mxu1 }
 0x3b8   : > { %v2018_v54 = vadd.f32 %v2009_v53, %v1906_v49  ;;  %v3124_v55 = vpop.f32.mrb[49].mxu1 }
 0x3b9   : > { %v2012_v3 = vpop.f32.mrb[50].mxu1 }
 0x3ba   : > { %v2021_v56 = vadd.f32 %v2012_v3, %v1909_v6  ;;  %v3125_v57 = vpop.f32.mrb[51].mxu1 }
 0x3bf   : > { %v2121_v58 = vpop.f32.mrb[52].mxu1 }
 0x3c0   : > { %v2130_v59 = vadd.f32 %v2121_v58, %v2018_v54  ;;  %v3130_v61 = vpop.f32.mrb[53].mxu1 }
 0x3c1   : > { %v2124_v62 = vpop.f32.mrb[54].mxu1 }
 0x3c2   : > { %v2133_v63 = vadd.f32 %v2124_v62, %v2021_v56  ;;  %v3131_v1 = vpop.f32.mrb[55].mxu1  ;;  %v2700_v62 = vld [vmem:[%s3977_s6] sm:$0xff] }
 0x3c3   : > { %3165 = vmatprep.mubr.msk.f32.mxu1 %vm2702_vm7, %v2700_v62 }
 0x3c7   : > { %v2233_v2 = vpop.f32.mrb[56].mxu1 }
 0x3c8   : > { %v2242_v4 = vadd.f32 %v2233_v2, %v2130_v59  ;;  %v3136_v5 = vpop.f32.mrb[57].mxu1 }
 0x3c9   : > { %v2236_v7 = vpop.f32.mrb[58].mxu1 }
 0x3ca   : > { %v2245_v8 = vadd.f32 %v2236_v7, %v2133_v63  ;;  %v3137_v9 = vpop.f32.mrb[59].mxu1 }
 0x3cf   : > { %v2345_v10 = vpop.f32.mrb[60].mxu1 }
 0x3d0   : > { %v2354_v11 = vadd.f32 %v2345_v10, %v2242_v4  ;;  %v3142_v12 = vpop.f32.mrb[61].mxu1  ;;  %v2701_v4 = vld [vmem:[%s3977_s6 + $0x8] sm:$0xff] }
 0x3d1   : > { %v2348_v13 = vpop.f32.mrb[62].mxu1 }
 0x3d2   : > { %v2357_v14 = vadd.f32 %v2348_v13, %v2245_v8  ;;  %v3143_v15 = vpop.f32.mrb[63].mxu1 }
 0x3d7   : > { %v2457_v16 = vpop.f32.mrb[64].mxu1 }
 0x3d8   : > { %v2466_v17 = vadd.f32 %v2457_v16, %v2354_v11  ;;  %v3148_v18 = vpop.f32.mrb[65].mxu1 }
 0x3d9   : > { %v2460_v19 = vpop.f32.mrb[66].mxu1 }
 0x3da   : > { %v2469_v21 = vadd.f32 %v2460_v19, %v2357_v14  ;;  %v3149_v22 = vpop.f32.mrb[67].mxu1 }
 0x3df   : > { %v2569_v20 = vpop.f32.mrb[68].mxu1 }
 0x3e0   : > { %v2578_v23 = vadd.f32 %v2569_v20, %v2466_v17  ;;  %v3154_v24 = vpop.f32.mrb[69].mxu1 }
 0x3e1   : > { %v2572_v25 = vpop.f32.mrb[70].mxu1 }
 0x3e2   : > { %v2581_v26 = vadd.f32 %v2572_v25, %v2469_v21  ;;  %v3155_v27 = vpop.f32.mrb[71].mxu1  ;;  %v2596_v30 = vadd.f32 %v2587_v29, %v2578_v23 }
 0x3e4   : > { %v2599_v33 = vadd.f32 %v2592_v32, %v2581_v26  ;;  %v2602_v35 = vmax.f32 %v2596_v30, 0.0 }
 0x3e6   : > { %v2605_v39 = vmax.f32 %v2599_v33, 0.0  ;;  %v3891_v47 = vsel %vm3719_vm15, %v2602_v35, 0.0 }
 0x3e7   : > { %v2614_v53 = vsel %vm2613_vm0, %v3891_v47, 0.0 }
 0x3e8   : > { %v2611_v6 = vsel %vm3719_vm15, %v2605_v39, 0.0 }
 0x3e9   : > { %v2619_v3 = vsel %vm2613_vm0, %v2611_v6, 0.0 }
 0x401   : > { %v2526_v34 = vpop.f32.mrb[4].mxu0 }
 0x402   : > { %v2594_v36 = vadd.f32 %v2587_v29, %v2526_v34  ;;  %v2528_v37 = vpop.f32.mrb[5].mxu0 }
 0x403   : > { %v2595_v0 = vadd.f32 %v2587_v29, %v2528_v37  ;;  %v2530_v38 = vpop.f32.mrb[6].mxu0 }
 0x404   : > { %v2600_v40 = vmax.f32 %v2594_v36, 0.0  ;;  %v2597_v41 = vadd.f32 %v2592_v32, %v2530_v38  ;;  %v2532_v42 = vpop.f32.mrb[7].mxu0 }
 0x405   : > { %v2601_v43 = vmax.f32 %v2595_v0, 0.0  ;;  %v2598_v44 = vadd.f32 %v2592_v32, %v2532_v42 }
 0x406   : > { %v3887_v45 = vsel %vm3742_vm3, %v2600_v40, 0.0  ;;  %v2603_v46 = vmax.f32 %v2597_v41, 0.0 }
 0x407   : > { %v2607_v48 = vsel %vm3746_vm12, %v2601_v43, 0.0  ;;  %v2604_v49 = vmax.f32 %v2598_v44, 0.0 }
 0x408   : > { %v2609_v50 = vsel %vm3742_vm3, %v2603_v46, 0.0  ;;  %v2612_v51 = vadd.f32 %v2607_v48, %v3887_v45 }
 0x409   : > { %v2610_v52 = vsel %vm3746_vm12, %v2604_v49, 0.0 }
 0x40a   : > { %v2615_v54 = vadd.f32 %v2614_v53, %v2612_v51  ;;  %v2618_v55 = vadd.f32 %v2610_v52, %v2609_v50 }
 0x40c   : > { %2616 = vadd.xlane.f32.xlu0 %v2615_v54  ;;  %v2620_v56 = vadd.f32 %v2619_v3, %v2618_v55 }
 0x40e   : > { %2621 = vadd.xlane.f32.xlu1 %v2620_v56 }
 0x499   : > { %v2617_v57 = vpop.xlane.xlu0 %2616 }
 0x49a   : > { %v2623_v59 = vmul.f32 0.00390625, %v2617_v57 }
 0x49b   : > { %v2622_v58 = vpop.xlane.xlu1 %2621 }
 0x49c   : > { %v2624_v60 = vmul.f32 0.00390625, %v2622_v58 }
 0x49e   : > { %v3169_v61 = vpack.c.bf16 %v2624_v60, %v2623_v59 }
 0x4a0   : > { %3170 = vmatpush3.bf16.msra.mxu0 %v3169_v61 }
 0x4a3   : > { %3161 = vmatmul.mubr.msk.f32.vlgmr.msra.gmra.mrb[8].mxu0 %vm1618_vm10, %v2625_v31 }
 0x576   : > { %v2695_v63 = vpop.f32.mrb[8].mxu0 }
 0x577   : > { %v2699_v1 = vmax.f32 %v2695_v63, 0.0  ;;  %v3162_v2 = vpop.f32.mrb[9].mxu0 }
 0x579   : > { %3163 = vmatprep.subr.msk.mxu1 %vm3996_vm8, %v2699_v1 }
 0x57a   : > { %3164 = vmatpush3.msk.msra.mxu1 %vm3997_vm11, %v2699_v1 }
 0x57b   : > { %3166 = vmatmul.mubr.msk.f32.vlgmr.msra.gmra.mrb[72].mxu1 %vm2702_vm7, %v2701_v4 }
 0x64e   : > { %v3167_v5 = vpop.f32.mrb[72].mxu1 }
 0x64f   : > { %v3002_v7 = vmul.f32 -1.442695, %v3167_v5  ;;  %v2778_v8 = vpop.f32.mrb[73].mxu1 }
 0x650   : > { %v3001_v9 = vmul.f32 -1.442695, %v2778_v8 }
 0x651   : > { %3327 = vpow2.f32 %v3002_v7 }
 0x652   : > { %3329 = vpow2.f32 %v3001_v9 }
 0x65b   : > { %v3328_v10 = vpop.eup %3327 }
 0x65c   : > { %v3330_v11 = vpop.eup %3329  ;;  %v2794_v12 = vadd.f32 1.0, %v3328_v10 }
 0x65d   : > { %v2793_v13 = vadd.f32 1.0, %v3330_v11 }
 0x65e   : > { %3331 = vrcp.f32 %v2794_v12 }
 0x65f   : > { %3333 = vrcp.f32 %v2793_v13 }
 0x668   : > { %v3332_v14 = vpop.eup %3331 }
 0x669   : > { %v3334_v15 = vpop.eup %3333  ;;  %2806 = vperm.xlu1 %3300, %v3332_v14  }
 0x66a   : > { %2801 = vperm.xlu0 %3299, %v3334_v15  }
 0x6e8   : > { %v2807_v16 = vpop.permute.xlu1 %2806 }
 0x6e9   : > { %v2812_v17 = vmul.f32 %v2807_v16, %v2609_v50  ;;  %v2813_v18 = vmul.f32 %v2807_v16, %v2610_v52  ;;  %v2814_v19 = vmul.f32 %v2807_v16, %v2611_v6  ;;  %v2802_v21 = vpop.permute.xlu0 %2801 }
 0x6ea   : > { %v2809_v22 = vmul.f32 %v2802_v21, %v3887_v45  ;;  %v2810_v20 = vmul.f32 %v2802_v21, %v2607_v48  ;;  %v2811_v23 = vmul.f32 %v2802_v21, %v3891_v47 }
 0x6eb   : > { %2818 = vst [vmem:[%s271_s20 + $0x18] sm:$0xff] %v2812_v17  ;;  %2819 = vst [vmem:[%s271_s20 + $0x20] sm:$0xff] %v2813_v18 }
 0x6ec   : > { %2820 = vst.msk [vmem:[%s271_s20 + $0x28] sm:$0xff] %vm2613_vm0, %v2814_v19  ;;  %2815 = vst [vmem:[%s271_s20] sm:$0xff] %v2809_v22 }
 0x6ed   : > { %2816 = vst [vmem:[%s271_s20 + $0x8] sm:$0xff] %v2810_v20  ;;  %2817 = vst.msk [vmem:[%s271_s20 + $0x10] sm:$0xff] %vm2613_vm0, %v2811_v23 }
 0x6ee   : > { %3348 = shalt.err (!%p3345_p3)
}
 0x6ef   : > { %s3349_s15 = scalar_lea.hbm %s3926_s8, 768  ;;  %s3353_s19 = scalar_lea.hbm %s3978_s7, 1536 }
 0x6f0   : > { %p3350_p4 = scmp.ne.s32.totalorder %s3926_s8, %s3349_s15  ;;  %p3354_p9 = scmp.lt.u32.totalorder %s3926_s8, %s3978_s7 }
 0x6f1   : > { %p3355_p10 = scmp.lt.u32.totalorder %s3353_s19, %s3349_s15  ;;  %p3357_p12 = scmp.lt.u32.totalorder %s3349_s15, %s3926_s8 }
 0x6f2   : > { %p3351_p7 = pnand %p3350_p4, %p3494_p5 }
 0x6f3   : > { %p3356_p11 = por %p3355_p10, %p3354_p9 }
 0x6f4   : > { %p3352_p8 = pneg %p3351_p7 }
 0x6f5   : > { %p3358_p13 = por %p3357_p12, %p3356_p11 }
 0x6f7   : > { %p3359_p0 = pnand %p3358_p13, %p3352_p8 }
 0x6f9   : > { %3362 = shalt.err (!%p3359_p0)
}
 0x6fa   : > { %s3414_s23 = smov 384   ;;  %s3415_s29 = smov 24  }
 0x6fb   : > { %3244 = dma.vmem_to_hbm [thread:$0]  (%p3494_p5), %s3919_s21, 768, %s3926_s8, %s3930_s28, %s3414_s23, %s3414_s23, %s3415_s29  }
 0x6fc PF: > { %p3250_p1 = scmp.ge.s32.totalorder %s3397_s27, 2  ;;  %s2850_s17 = sand.u32 1, %s3385_s24  }
 0x6fd   : > { %s2851_s9 = scalar_lea.sflag [#allocation4], %s2850_s17 }
 0x6fe   : > { %p3247_p2 = pnand %p3250_p1, %p3498_p6 }
 0x700   : > { %3380 = dma.done.wait (!%p3247_p2), %s2851_s9, 768  }
 0x701   : > { %3382 = vsyncadd (!%p3247_p2), %s2851_s9, 4294966528  ;;  %p17_p3 = scmp.ge.s32.totalorder %s3481_s30, 4   ;;  %s3998_s24 = smov %s3389_s25 }
 0x702   : > { %s3999_s25 = smov %s3393_s26  ;;  %s4000_s26 = smov %s3492_s10 }
 0x703   : > { %s4001_s27 = smov %s3481_s30  ;;  %19 = sbr.rel (!%p17_p3) target bundleno = 3 (0x3), region = 99 }
 0x70a   :  { %2856 = vsyncpa [#allocation4], 1 }
 0x70b   :  { %2858 = vsyncpa [#allocation4 + $0x1], 1 }

</bundles_post_ra>
